<compile_context>
chip_gen: v5e
topology: v5e:2x2
jax: 0.10.0
libtpu: 0.0.40
codegen_flags: <defaults>
</compile_context>

<pallas_src>
import functools

import jax
import jax.numpy as jnp
from jax.experimental import pallas as pl
from jax.experimental.pallas import tpu as pltpu  # noqa: F401  (TPU backend)


# ------------------------------ fused kernel ---------------------------------

def grunet_kernel(*refs, num_layers, seq_len, input_size, scale):
    """Whole forward pass in one un-gridded kernel (everything fits VMEM)."""
    L = seq_len

    x_ref = refs[0]                                            # (L, B, 1)
    layer_refs = [tuple(refs[1 + 4 * l: 1 + 4 * (l + 1)]) for l in range(num_layers)]
    (wq_ref, bq_ref, wk_ref, bk_ref, wv_ref, bv_ref,
     wfc_ref, bfc_ref, out_ref) = refs[1 + 4 * num_layers:]

    B = x_ref.shape[1]
    H = layer_refs[0][1].shape[0]                              # whh: (H, 3H)

    # ------------------------------ stacked GRU ------------------------------
    # `seq` is the current layer's per-timestep input; starts as the raw (B, 1)
    # scalar inputs and ends as the last layer's hidden states (B, H).
    seq = [x_ref[t] for t in range(L)]                         # static indices

    for l in range(num_layers):
        wih_ref, whh_ref, bih_ref, bhn_ref = layer_refs[l]
        wih = wih_ref[...]                                     # (in_dim, 3H)
        whh = whh_ref[...]                                     # (H, 3H)
        bih = bih_ref[...]                                     # (1, 3H)  (b_hh for r,z folded in)
        bhn = bhn_ref[...]                                     # (1, H)

        # Input projection for the whole sequence -> off the serial recurrence.
        if l == 0 and input_size == 1:
            ih = [seq[t] * wih + bih for t in range(L)]        # VPU broadcast-mul only
        else:
            ih = [jnp.dot(seq[t], wih, preferred_element_type=jnp.float32) + bih
                  for t in range(L)]

        h = jnp.zeros((B, H), jnp.float32)
        outs = []
        for t in range(L):                                     # static, fully unrolled
            hh = jnp.dot(h, whh, preferred_element_type=jnp.float32)   # (B, 3H)
            rz = jax.nn.sigmoid(ih[t][:, :2 * H] + hh[:, :2 * H])
            r, z = rz[:, :H], rz[:, H:]
            n = jnp.tanh(ih[t][:, 2 * H:] + r * (hh[:, 2 * H:] + bhn))
            h = (1.0 - z) * n + z * h
            outs.append(h)
        seq = outs

    # --------------------- last-query self-attention + FC --------------------
    wq, bq = wq_ref[...], bq_ref[...]
    wk, bk = wk_ref[...], bk_ref[...]
    wv, bv = wv_ref[...], bv_ref[...]
    wfc, bfc = wfc_ref[...], bfc_ref[...]

    q = jnp.dot(seq[-1], wq, preferred_element_type=jnp.float32) + bq          # (B, d)
    ks = [jnp.dot(seq[t], wk, preferred_element_type=jnp.float32) + bk for t in range(L)]
    vs = [jnp.dot(seq[t], wv, preferred_element_type=jnp.float32) + bv for t in range(L)]

    # scores[b, t] = scale * <q[b], k_t[b]>
    scores = [jnp.sum(q * ks[t], axis=-1, keepdims=True) * scale for t in range(L)]  # (B, 1)
    m = scores[0]
    for t in range(1, L):
        m = jnp.maximum(m, scores[t])
    es = [jnp.exp(scores[t] - m) for t in range(L)]
    denom = es[0]
    for t in range(1, L):
        denom = denom + es[t]
    inv = pl.reciprocal(denom, approx=True)                    # EUP slot (free)

    attended = (es[0] * inv) * vs[0]                           # (B, H)
    for t in range(1, L):
        attended = attended + (es[t] * inv) * vs[t]

    logits = jnp.dot(attended, wfc, preferred_element_type=jnp.float32) + bfc  # (B, C)
    out_ref[...] = logits.astype(out_ref.dtype)


# ------------------------------ forward wrapper -------------------------------

def grunet_forward(x_bl, params):
    x = x_bl.astype(jnp.float32)
    B, L = x.shape
    gru = params["gru"]
    num_layers = len(gru)
    input_size = gru[0]["wih"].shape[1]
    H = gru[0]["whh"].shape[-1]
    sa, fc = params["sa"], params["fc"]
    C = fc["w"].shape[-1]

    # x.unsqueeze(-1) (PyTorch), then batch-major -> time-major: (L, B, 1)
    x_lb1 = jnp.transpose(x, (1, 0))[..., None]

    args = [x_lb1]
    for layer in gru:
        wih = jnp.concatenate([layer["wih"][g] for g in range(3)], axis=-1)    # (in, 3H)
        whh = jnp.concatenate([layer["whh"][g] for g in range(3)], axis=-1)    # (H, 3H)
        bih = jnp.concatenate([layer["bih"][0] + layer["bhh"][0],              # r: fold b_hh
                               layer["bih"][1] + layer["bhh"][1],              # z: fold b_hh
                               layer["bih"][2]], axis=-1)                      # n: keep separate
        bhn = layer["bhh"][2]                                                  # (1, H)
        args += [wih, whh, bih, bhn]
    args += [sa["wq"], sa["bq"], sa["wk"], sa["bk"], sa["wv"], sa["bv"],
             fc["w"], fc["b"]]

    kernel = functools.partial(
        grunet_kernel,
        num_layers=num_layers,
        seq_len=L,
        input_size=input_size,
        scale=float((H // 8) ** -0.5),
    )
    # Inputs + weights total a few tens of KB, far under VMEM on v5e/v6e
    # (128 MiB) and v7x (64 MiB), so the whole problem is a single un-gridded
    # block (default whole-array BlockSpecs, resident in VMEM).
    # TODO(synk): if B grows large, add a leading batch grid axis marked
    # "parallel" so v7x's two TensorCores split the batch.
    return pl.pallas_call(
        kernel,
        out_shape=jax.ShapeDtypeStruct((B, C), jnp.float32),
    )(*args)


# ------------------------------ pure-JAX reference ---------------------------

def gru_layer_ref(x_lbi, wih, whh, bih, bhh):
    H = whh.shape[-1]
    B = x_lbi.shape[1]

    def step(h, x_t):
        r = jax.nn.sigmoid(x_t @ wih[0] + bih[0] + h @ whh[0] + bhh[0])
        z = jax.nn.sigmoid(x_t @ wih[1] + bih[1] + h @ whh[1] + bhh[1])
        n = jnp.tanh(x_t @ wih[2] + bih[2] + r * (h @ whh[2] + bhh[2]))
        h_new = (1.0 - z) * n + z * h
        return h_new, h_new

    h0 = jnp.zeros((B, H), jnp.float32)
    _, ys = jax.lax.scan(step, h0, x_lbi)
    return ys


def grunet_ref(x_bl, params):
    x = x_bl[..., None].astype(jnp.float32)
    h = jnp.transpose(x, (1, 0, 2))
    for layer in params["gru"]:
        h = gru_layer_ref(h, layer["wih"], layer["whh"], layer["bih"], layer["bhh"])
    out = jnp.transpose(h, (1, 0, 2))                          # (B, L, H)
    H = out.shape[-1]
    sa, fc = params["sa"], params["fc"]
    q = jnp.einsum("blh,hd->bld", out, sa["wq"]) + sa["bq"]
    k = jnp.einsum("blh,hd->bld", out, sa["wk"]) + sa["bk"]
    v = jnp.einsum("blh,hd->bld", out, sa["wv"]) + sa["bv"]
    attn = jax.nn.softmax(jnp.einsum("bld,bmd->blm", q, k) * (H // 8) ** -0.5, axis=-1)
    attended = jnp.einsum("blm,bmh->blh", attn, v)
    return attended[:, -1, :] @ fc["w"] + fc["b"]


# ------------------------------ parameter init --------------------------------

def init_params(key, input_size, hidden_size, num_layers, num_classes):
    H, H8 = hidden_size, hidden_size // 8
    bound = 1.0 / (H ** 0.5)
    keys = iter(jax.random.split(key, 4 * num_layers + 8))

    def u(shape, b=bound):
        return jax.random.uniform(next(keys), shape, jnp.float32, -b, b)

    gru = []
    for layer in range(num_layers):
        in_dim = input_size if layer == 0 else H
        gru.append({
            "wih": u((3, in_dim, H)),   # gate order r, z, n ; stored transposed
            "whh": u((3, H, H)),
            "bih": u((3, 1, H)),
            "bhh": u((3, 1, H)),
        })
    sa = {
        "wq": u((H, H8)), "bq": u((1, H8)),
        "wk": u((H, H8)), "bk": u((1, H8)),
        "wv": u((H, H)),  "bv": u((1, H)),
    }
    fc = {"w": u((H, num_classes)), "b": u((1, num_classes))}
    # TODO(synk): CrossAttention params are unused in GRUNet.forward(); not created.
    return {"gru": gru, "sa": sa, "fc": fc}


# ----------------------------------- main --------------------------------------

if __name__ == "__main__":
    B, L = 4, 8
    input_size, hidden_size, num_layers, num_classes = 1, 32, 2, 4

    key = jax.random.PRNGKey(0)
    kp, kx = jax.random.split(key)
    params = init_params(kp, input_size, hidden_size, num_layers, num_classes)
    x = jax.random.normal(kx, (B, L), jnp.float32)

    out = grunet_forward(x, params)
    out = jax.block_until_ready(out)

    ref = grunet_ref(x, params)
    assert out.shape == (B, num_classes)
    # 1e-3 tolerance: approx reciprocal (EUP) + reordered f32 accumulation.
    assert jnp.allclose(out, ref, atol=1e-3, rtol=1e-3), (out, ref)
    print("KERNEL_OK")
</pallas_src>

<mosaic_0001>
module attributes {stable_mosaic.version = 11 : i64} {
  func.func @grunet_kernel(%arg0: memref<8x4x1xf32, #tpu.memory_space<vmem>>, %arg1: memref<1x96xf32, #tpu.memory_space<vmem>>, %arg2: memref<32x96xf32, #tpu.memory_space<vmem>>, %arg3: memref<1x96xf32, #tpu.memory_space<vmem>>, %arg4: memref<1x32xf32, #tpu.memory_space<vmem>>, %arg5: memref<32x96xf32, #tpu.memory_space<vmem>>, %arg6: memref<32x96xf32, #tpu.memory_space<vmem>>, %arg7: memref<1x96xf32, #tpu.memory_space<vmem>>, %arg8: memref<1x32xf32, #tpu.memory_space<vmem>>, %arg9: memref<32x4xf32, #tpu.memory_space<vmem>>, %arg10: memref<1x4xf32, #tpu.memory_space<vmem>>, %arg11: memref<32x4xf32, #tpu.memory_space<vmem>>, %arg12: memref<1x4xf32, #tpu.memory_space<vmem>>, %arg13: memref<32x32xf32, #tpu.memory_space<vmem>>, %arg14: memref<1x32xf32, #tpu.memory_space<vmem>>, %arg15: memref<32x4xf32, #tpu.memory_space<vmem>>, %arg16: memref<1x4xf32, #tpu.memory_space<vmem>>, %arg17: memref<4x4xf32, #tpu.memory_space<vmem>>) attributes {dimension_semantics = [], scalar_prefetch = 0 : i64, scratch_operands = 0 : i64, tpu.core_type = #tpu.core_type<tc>} {
    %c0 = arith.constant 0 : index
    %c0_0 = arith.constant 0 : index
    %c0_1 = arith.constant 0 : index
    %0 = vector.load %arg0[%c0, %c0_0, %c0_1] : memref<8x4x1xf32, #tpu.memory_space<vmem>>, vector<1x4x1xf32>
    %1 = vector.shape_cast %0 : vector<1x4x1xf32> to vector<4x1xf32>
    %c1 = arith.constant 1 : index
    %c0_2 = arith.constant 0 : index
    %c0_3 = arith.constant 0 : index
    %2 = vector.load %arg0[%c1, %c0_2, %c0_3] : memref<8x4x1xf32, #tpu.memory_space<vmem>>, vector<1x4x1xf32>
    %3 = vector.shape_cast %2 : vector<1x4x1xf32> to vector<4x1xf32>
    %c2 = arith.constant 2 : index
    %c0_4 = arith.constant 0 : index
    %c0_5 = arith.constant 0 : index
    %4 = vector.load %arg0[%c2, %c0_4, %c0_5] : memref<8x4x1xf32, #tpu.memory_space<vmem>>, vector<1x4x1xf32>
    %5 = vector.shape_cast %4 : vector<1x4x1xf32> to vector<4x1xf32>
    %c3 = arith.constant 3 : index
    %c0_6 = arith.constant 0 : index
    %c0_7 = arith.constant 0 : index
    %6 = vector.load %arg0[%c3, %c0_6, %c0_7] : memref<8x4x1xf32, #tpu.memory_space<vmem>>, vector<1x4x1xf32>
    %7 = vector.shape_cast %6 : vector<1x4x1xf32> to vector<4x1xf32>
    %c4 = arith.constant 4 : index
    %c0_8 = arith.constant 0 : index
    %c0_9 = arith.constant 0 : index
    %8 = vector.load %arg0[%c4, %c0_8, %c0_9] : memref<8x4x1xf32, #tpu.memory_space<vmem>>, vector<1x4x1xf32>
    %9 = vector.shape_cast %8 : vector<1x4x1xf32> to vector<4x1xf32>
    %c5 = arith.constant 5 : index
    %c0_10 = arith.constant 0 : index
    %c0_11 = arith.constant 0 : index
    %10 = vector.load %arg0[%c5, %c0_10, %c0_11] : memref<8x4x1xf32, #tpu.memory_space<vmem>>, vector<1x4x1xf32>
    %11 = vector.shape_cast %10 : vector<1x4x1xf32> to vector<4x1xf32>
    %c6 = arith.constant 6 : index
    %c0_12 = arith.constant 0 : index
    %c0_13 = arith.constant 0 : index
    %12 = vector.load %arg0[%c6, %c0_12, %c0_13] : memref<8x4x1xf32, #tpu.memory_space<vmem>>, vector<1x4x1xf32>
    %13 = vector.shape_cast %12 : vector<1x4x1xf32> to vector<4x1xf32>
    %c7 = arith.constant 7 : index
    %c0_14 = arith.constant 0 : index
    %c0_15 = arith.constant 0 : index
    %14 = vector.load %arg0[%c7, %c0_14, %c0_15] : memref<8x4x1xf32, #tpu.memory_space<vmem>>, vector<1x4x1xf32>
    %15 = vector.shape_cast %14 : vector<1x4x1xf32> to vector<4x1xf32>
    %c0_16 = arith.constant 0 : index
    %c0_17 = arith.constant 0 : index
    %16 = vector.load %arg1[%c0_16, %c0_17] : memref<1x96xf32, #tpu.memory_space<vmem>>, vector<1x96xf32>
    %c0_18 = arith.constant 0 : index
    %c0_19 = arith.constant 0 : index
    %17 = vector.load %arg2[%c0_18, %c0_19] : memref<32x96xf32, #tpu.memory_space<vmem>>, vector<32x96xf32>
    %c0_20 = arith.constant 0 : index
    %c0_21 = arith.constant 0 : index
    %18 = vector.load %arg3[%c0_20, %c0_21] : memref<1x96xf32, #tpu.memory_space<vmem>>, vector<1x96xf32>
    %c0_22 = arith.constant 0 : index
    %c0_23 = arith.constant 0 : index
    %19 = vector.load %arg4[%c0_22, %c0_23] : memref<1x32xf32, #tpu.memory_space<vmem>>, vector<1x32xf32>
    %20 = vector.broadcast %1 : vector<4x1xf32> to vector<4x96xf32>
    %21 = vector.broadcast %16 : vector<1x96xf32> to vector<4x96xf32>
    %22 = arith.mulf %20, %21 : vector<4x96xf32>
    %23 = vector.broadcast %18 : vector<1x96xf32> to vector<4x96xf32>
    %24 = arith.addf %22, %23 : vector<4x96xf32>
    %25 = vector.broadcast %3 : vector<4x1xf32> to vector<4x96xf32>
    %26 = vector.broadcast %16 : vector<1x96xf32> to vector<4x96xf32>
    %27 = arith.mulf %25, %26 : vector<4x96xf32>
    %28 = vector.broadcast %18 : vector<1x96xf32> to vector<4x96xf32>
    %29 = arith.addf %27, %28 : vector<4x96xf32>
    %30 = vector.broadcast %5 : vector<4x1xf32> to vector<4x96xf32>
    %31 = vector.broadcast %16 : vector<1x96xf32> to vector<4x96xf32>
    %32 = arith.mulf %30, %31 : vector<4x96xf32>
    %33 = vector.broadcast %18 : vector<1x96xf32> to vector<4x96xf32>
    %34 = arith.addf %32, %33 : vector<4x96xf32>
    %35 = vector.broadcast %7 : vector<4x1xf32> to vector<4x96xf32>
    %36 = vector.broadcast %16 : vector<1x96xf32> to vector<4x96xf32>
    %37 = arith.mulf %35, %36 : vector<4x96xf32>
    %38 = vector.broadcast %18 : vector<1x96xf32> to vector<4x96xf32>
    %39 = arith.addf %37, %38 : vector<4x96xf32>
    %40 = vector.broadcast %9 : vector<4x1xf32> to vector<4x96xf32>
    %41 = vector.broadcast %16 : vector<1x96xf32> to vector<4x96xf32>
    %42 = arith.mulf %40, %41 : vector<4x96xf32>
    %43 = vector.broadcast %18 : vector<1x96xf32> to vector<4x96xf32>
    %44 = arith.addf %42, %43 : vector<4x96xf32>
    %45 = vector.broadcast %11 : vector<4x1xf32> to vector<4x96xf32>
    %46 = vector.broadcast %16 : vector<1x96xf32> to vector<4x96xf32>
    %47 = arith.mulf %45, %46 : vector<4x96xf32>
    %48 = vector.broadcast %18 : vector<1x96xf32> to vector<4x96xf32>
    %49 = arith.addf %47, %48 : vector<4x96xf32>
    %50 = vector.broadcast %13 : vector<4x1xf32> to vector<4x96xf32>
    %51 = vector.broadcast %16 : vector<1x96xf32> to vector<4x96xf32>
    %52 = arith.mulf %50, %51 : vector<4x96xf32>
    %53 = vector.broadcast %18 : vector<1x96xf32> to vector<4x96xf32>
    %54 = arith.addf %52, %53 : vector<4x96xf32>
    %55 = vector.broadcast %15 : vector<4x1xf32> to vector<4x96xf32>
    %56 = vector.broadcast %16 : vector<1x96xf32> to vector<4x96xf32>
    %57 = arith.mulf %55, %56 : vector<4x96xf32>
    %58 = vector.broadcast %18 : vector<1x96xf32> to vector<4x96xf32>
    %59 = arith.addf %57, %58 : vector<4x96xf32>
    %cst = arith.constant 0.000000e+00 : f32
    %60 = vector.broadcast %cst : f32 to vector<4x32xf32>
    %cst_24 = arith.constant dense<0.000000e+00> : vector<4x96xf32>
    %61 = tpu.matmul %60, %17, %cst_24 {dimension_numbers = #tpu.dot_dimension_numbers<[1], [0], [0], [1], [0, 0, 1, 1], [], []>} : vector<4x32xf32>, vector<32x96xf32>, vector<4x96xf32> -> vector<4x96xf32>
    %62 = vector.extract_strided_slice %24 {offsets = [0, 0], sizes = [4, 64], strides = [1, 1]} : vector<4x96xf32> to vector<4x64xf32>
    %63 = vector.extract_strided_slice %61 {offsets = [0, 0], sizes = [4, 64], strides = [1, 1]} : vector<4x96xf32> to vector<4x64xf32>
    %64 = arith.addf %62, %63 : vector<4x64xf32>
    %65 = arith.negf %64 : vector<4x64xf32>
    %66 = math.exp %65 : vector<4x64xf32>
    %cst_25 = arith.constant 1.000000e+00 : f32
    %67 = vector.broadcast %cst_25 : f32 to vector<4x64xf32>
    %68 = arith.addf %67, %66 : vector<4x64xf32>
    %69 = arith.divf %67, %68 : vector<4x64xf32>
    %70 = vector.extract_strided_slice %69 {offsets = [0, 0], sizes = [4, 32], strides = [1, 1]} : vector<4x64xf32> to vector<4x32xf32>
    %71 = vector.extract_strided_slice %69 {offsets = [0, 32], sizes = [4, 32], strides = [1, 1]} : vector<4x64xf32> to vector<4x32xf32>
    %72 = vector.extract_strided_slice %24 {offsets = [0, 64], sizes = [4, 32], strides = [1, 1]} : vector<4x96xf32> to vector<4x32xf32>
    %73 = vector.extract_strided_slice %61 {offsets = [0, 64], sizes = [4, 32], strides = [1, 1]} : vector<4x96xf32> to vector<4x32xf32>
    %74 = vector.broadcast %19 : vector<1x32xf32> to vector<4x32xf32>
    %75 = arith.addf %73, %74 : vector<4x32xf32>
    %76 = arith.mulf %70, %75 : vector<4x32xf32>
    %77 = arith.addf %72, %76 : vector<4x32xf32>
    %78 = math.tanh %77 : vector<4x32xf32>
    %cst_26 = arith.constant 1.000000e+00 : f32
    %79 = vector.broadcast %cst_26 : f32 to vector<4x32xf32>
    %80 = arith.subf %79, %71 : vector<4x32xf32>
    %81 = arith.mulf %80, %78 : vector<4x32xf32>
    %82 = arith.mulf %71, %60 : vector<4x32xf32>
    %83 = arith.addf %81, %82 : vector<4x32xf32>
    %cst_27 = arith.constant dense<0.000000e+00> : vector<4x96xf32>
    %84 = tpu.matmul %83, %17, %cst_27 {dimension_numbers = #tpu.dot_dimension_numbers<[1], [0], [0], [1], [0, 0, 1, 1], [], []>} : vector<4x32xf32>, vector<32x96xf32>, vector<4x96xf32> -> vector<4x96xf32>
    %85 = vector.extract_strided_slice %29 {offsets = [0, 0], sizes = [4, 64], strides = [1, 1]} : vector<4x96xf32> to vector<4x64xf32>
    %86 = vector.extract_strided_slice %84 {offsets = [0, 0], sizes = [4, 64], strides = [1, 1]} : vector<4x96xf32> to vector<4x64xf32>
    %87 = arith.addf %85, %86 : vector<4x64xf32>
    %88 = arith.negf %87 : vector<4x64xf32>
    %89 = math.exp %88 : vector<4x64xf32>
    %cst_28 = arith.constant 1.000000e+00 : f32
    %90 = vector.broadcast %cst_28 : f32 to vector<4x64xf32>
    %91 = arith.addf %90, %89 : vector<4x64xf32>
    %92 = arith.divf %90, %91 : vector<4x64xf32>
    %93 = vector.extract_strided_slice %92 {offsets = [0, 0], sizes = [4, 32], strides = [1, 1]} : vector<4x64xf32> to vector<4x32xf32>
    %94 = vector.extract_strided_slice %92 {offsets = [0, 32], sizes = [4, 32], strides = [1, 1]} : vector<4x64xf32> to vector<4x32xf32>
    %95 = vector.extract_strided_slice %29 {offsets = [0, 64], sizes = [4, 32], strides = [1, 1]} : vector<4x96xf32> to vector<4x32xf32>
    %96 = vector.extract_strided_slice %84 {offsets = [0, 64], sizes = [4, 32], strides = [1, 1]} : vector<4x96xf32> to vector<4x32xf32>
    %97 = vector.broadcast %19 : vector<1x32xf32> to vector<4x32xf32>
    %98 = arith.addf %96, %97 : vector<4x32xf32>
    %99 = arith.mulf %93, %98 : vector<4x32xf32>
    %100 = arith.addf %95, %99 : vector<4x32xf32>
    %101 = math.tanh %100 : vector<4x32xf32>
    %cst_29 = arith.constant 1.000000e+00 : f32
    %102 = vector.broadcast %cst_29 : f32 to vector<4x32xf32>
    %103 = arith.subf %102, %94 : vector<4x32xf32>
    %104 = arith.mulf %103, %101 : vector<4x32xf32>
    %105 = arith.mulf %94, %83 : vector<4x32xf32>
    %106 = arith.addf %104, %105 : vector<4x32xf32>
    %cst_30 = arith.constant dense<0.000000e+00> : vector<4x96xf32>
    %107 = tpu.matmul %106, %17, %cst_30 {dimension_numbers = #tpu.dot_dimension_numbers<[1], [0], [0], [1], [0, 0, 1, 1], [], []>} : vector<4x32xf32>, vector<32x96xf32>, vector<4x96xf32> -> vector<4x96xf32>
    %108 = vector.extract_strided_slice %34 {offsets = [0, 0], sizes = [4, 64], strides = [1, 1]} : vector<4x96xf32> to vector<4x64xf32>
    %109 = vector.extract_strided_slice %107 {offsets = [0, 0], sizes = [4, 64], strides = [1, 1]} : vector<4x96xf32> to vector<4x64xf32>
    %110 = arith.addf %108, %109 : vector<4x64xf32>
    %111 = arith.negf %110 : vector<4x64xf32>
    %112 = math.exp %111 : vector<4x64xf32>
    %cst_31 = arith.constant 1.000000e+00 : f32
    %113 = vector.broadcast %cst_31 : f32 to vector<4x64xf32>
    %114 = arith.addf %113, %112 : vector<4x64xf32>
    %115 = arith.divf %113, %114 : vector<4x64xf32>
    %116 = vector.extract_strided_slice %115 {offsets = [0, 0], sizes = [4, 32], strides = [1, 1]} : vector<4x64xf32> to vector<4x32xf32>
    %117 = vector.extract_strided_slice %115 {offsets = [0, 32], sizes = [4, 32], strides = [1, 1]} : vector<4x64xf32> to vector<4x32xf32>
    %118 = vector.extract_strided_slice %34 {offsets = [0, 64], sizes = [4, 32], strides = [1, 1]} : vector<4x96xf32> to vector<4x32xf32>
    %119 = vector.extract_strided_slice %107 {offsets = [0, 64], sizes = [4, 32], strides = [1, 1]} : vector<4x96xf32> to vector<4x32xf32>
    %120 = vector.broadcast %19 : vector<1x32xf32> to vector<4x32xf32>
    %121 = arith.addf %119, %120 : vector<4x32xf32>
    %122 = arith.mulf %116, %121 : vector<4x32xf32>
    %123 = arith.addf %118, %122 : vector<4x32xf32>
    %124 = math.tanh %123 : vector<4x32xf32>
    %cst_32 = arith.constant 1.000000e+00 : f32
    %125 = vector.broadcast %cst_32 : f32 to vector<4x32xf32>
    %126 = arith.subf %125, %117 : vector<4x32xf32>
    %127 = arith.mulf %126, %124 : vector<4x32xf32>
    %128 = arith.mulf %117, %106 : vector<4x32xf32>
    %129 = arith.addf %127, %128 : vector<4x32xf32>
    %cst_33 = arith.constant dense<0.000000e+00> : vector<4x96xf32>
    %130 = tpu.matmul %129, %17, %cst_33 {dimension_numbers = #tpu.dot_dimension_numbers<[1], [0], [0], [1], [0, 0, 1, 1], [], []>} : vector<4x32xf32>, vector<32x96xf32>, vector<4x96xf32> -> vector<4x96xf32>
    %131 = vector.extract_strided_slice %39 {offsets = [0, 0], sizes = [4, 64], strides = [1, 1]} : vector<4x96xf32> to vector<4x64xf32>
    %132 = vector.extract_strided_slice %130 {offsets = [0, 0], sizes = [4, 64], strides = [1, 1]} : vector<4x96xf32> to vector<4x64xf32>
    %133 = arith.addf %131, %132 : vector<4x64xf32>
    %134 = arith.negf %133 : vector<4x64xf32>
    %135 = math.exp %134 : vector<4x64xf32>
    %cst_34 = arith.constant 1.000000e+00 : f32
    %136 = vector.broadcast %cst_34 : f32 to vector<4x64xf32>
    %137 = arith.addf %136, %135 : vector<4x64xf32>
    %138 = arith.divf %136, %137 : vector<4x64xf32>
    %139 = vector.extract_strided_slice %138 {offsets = [0, 0], sizes = [4, 32], strides = [1, 1]} : vector<4x64xf32> to vector<4x32xf32>
    %140 = vector.extract_strided_slice %138 {offsets = [0, 32], sizes = [4, 32], strides = [1, 1]} : vector<4x64xf32> to vector<4x32xf32>
    %141 = vector.extract_strided_slice %39 {offsets = [0, 64], sizes = [4, 32], strides = [1, 1]} : vector<4x96xf32> to vector<4x32xf32>
    %142 = vector.extract_strided_slice %130 {offsets = [0, 64], sizes = [4, 32], strides = [1, 1]} : vector<4x96xf32> to vector<4x32xf32>
    %143 = vector.broadcast %19 : vector<1x32xf32> to vector<4x32xf32>
    %144 = arith.addf %142, %143 : vector<4x32xf32>
    %145 = arith.mulf %139, %144 : vector<4x32xf32>
    %146 = arith.addf %141, %145 : vector<4x32xf32>
    %147 = math.tanh %146 : vector<4x32xf32>
    %cst_35 = arith.constant 1.000000e+00 : f32
    %148 = vector.broadcast %cst_35 : f32 to vector<4x32xf32>
    %149 = arith.subf %148, %140 : vector<4x32xf32>
    %150 = arith.mulf %149, %147 : vector<4x32xf32>
    %151 = arith.mulf %140, %129 : vector<4x32xf32>
    %152 = arith.addf %150, %151 : vector<4x32xf32>
    %cst_36 = arith.constant dense<0.000000e+00> : vector<4x96xf32>
    %153 = tpu.matmul %152, %17, %cst_36 {dimension_numbers = #tpu.dot_dimension_numbers<[1], [0], [0], [1], [0, 0, 1, 1], [], []>} : vector<4x32xf32>, vector<32x96xf32>, vector<4x96xf32> -> vector<4x96xf32>
    %154 = vector.extract_strided_slice %44 {offsets = [0, 0], sizes = [4, 64], strides = [1, 1]} : vector<4x96xf32> to vector<4x64xf32>
    %155 = vector.extract_strided_slice %153 {offsets = [0, 0], sizes = [4, 64], strides = [1, 1]} : vector<4x96xf32> to vector<4x64xf32>
    %156 = arith.addf %154, %155 : vector<4x64xf32>
    %157 = arith.negf %156 : vector<4x64xf32>
    %158 = math.exp %157 : vector<4x64xf32>
    %cst_37 = arith.constant 1.000000e+00 : f32
    %159 = vector.broadcast %cst_37 : f32 to vector<4x64xf32>
    %160 = arith.addf %159, %158 : vector<4x64xf32>
    %161 = arith.divf %159, %160 : vector<4x64xf32>
    %162 = vector.extract_strided_slice %161 {offsets = [0, 0], sizes = [4, 32], strides = [1, 1]} : vector<4x64xf32> to vector<4x32xf32>
    %163 = vector.extract_strided_slice %161 {offsets = [0, 32], sizes = [4, 32], strides = [1, 1]} : vector<4x64xf32> to vector<4x32xf32>
    %164 = vector.extract_strided_slice %44 {offsets = [0, 64], sizes = [4, 32], strides = [1, 1]} : vector<4x96xf32> to vector<4x32xf32>
    %165 = vector.extract_strided_slice %153 {offsets = [0, 64], sizes = [4, 32], strides = [1, 1]} : vector<4x96xf32> to vector<4x32xf32>
    %166 = vector.broadcast %19 : vector<1x32xf32> to vector<4x32xf32>
    %167 = arith.addf %165, %166 : vector<4x32xf32>
    %168 = arith.mulf %162, %167 : vector<4x32xf32>
    %169 = arith.addf %164, %168 : vector<4x32xf32>
    %170 = math.tanh %169 : vector<4x32xf32>
    %cst_38 = arith.constant 1.000000e+00 : f32
    %171 = vector.broadcast %cst_38 : f32 to vector<4x32xf32>
    %172 = arith.subf %171, %163 : vector<4x32xf32>
    %173 = arith.mulf %172, %170 : vector<4x32xf32>
    %174 = arith.mulf %163, %152 : vector<4x32xf32>
    %175 = arith.addf %173, %174 : vector<4x32xf32>
    %cst_39 = arith.constant dense<0.000000e+00> : vector<4x96xf32>
    %176 = tpu.matmul %175, %17, %cst_39 {dimension_numbers = #tpu.dot_dimension_numbers<[1], [0], [0], [1], [0, 0, 1, 1], [], []>} : vector<4x32xf32>, vector<32x96xf32>, vector<4x96xf32> -> vector<4x96xf32>
    %177 = vector.extract_strided_slice %49 {offsets = [0, 0], sizes = [4, 64], strides = [1, 1]} : vector<4x96xf32> to vector<4x64xf32>
    %178 = vector.extract_strided_slice %176 {offsets = [0, 0], sizes = [4, 64], strides = [1, 1]} : vector<4x96xf32> to vector<4x64xf32>
    %179 = arith.addf %177, %178 : vector<4x64xf32>
    %180 = arith.negf %179 : vector<4x64xf32>
    %181 = math.exp %180 : vector<4x64xf32>
    %cst_40 = arith.constant 1.000000e+00 : f32
    %182 = vector.broadcast %cst_40 : f32 to vector<4x64xf32>
    %183 = arith.addf %182, %181 : vector<4x64xf32>
    %184 = arith.divf %182, %183 : vector<4x64xf32>
    %185 = vector.extract_strided_slice %184 {offsets = [0, 0], sizes = [4, 32], strides = [1, 1]} : vector<4x64xf32> to vector<4x32xf32>
    %186 = vector.extract_strided_slice %184 {offsets = [0, 32], sizes = [4, 32], strides = [1, 1]} : vector<4x64xf32> to vector<4x32xf32>
    %187 = vector.extract_strided_slice %49 {offsets = [0, 64], sizes = [4, 32], strides = [1, 1]} : vector<4x96xf32> to vector<4x32xf32>
    %188 = vector.extract_strided_slice %176 {offsets = [0, 64], sizes = [4, 32], strides = [1, 1]} : vector<4x96xf32> to vector<4x32xf32>
    %189 = vector.broadcast %19 : vector<1x32xf32> to vector<4x32xf32>
    %190 = arith.addf %188, %189 : vector<4x32xf32>
    %191 = arith.mulf %185, %190 : vector<4x32xf32>
    %192 = arith.addf %187, %191 : vector<4x32xf32>
    %193 = math.tanh %192 : vector<4x32xf32>
    %cst_41 = arith.constant 1.000000e+00 : f32
    %194 = vector.broadcast %cst_41 : f32 to vector<4x32xf32>
    %195 = arith.subf %194, %186 : vector<4x32xf32>
    %196 = arith.mulf %195, %193 : vector<4x32xf32>
    %197 = arith.mulf %186, %175 : vector<4x32xf32>
    %198 = arith.addf %196, %197 : vector<4x32xf32>
    %cst_42 = arith.constant dense<0.000000e+00> : vector<4x96xf32>
    %199 = tpu.matmul %198, %17, %cst_42 {dimension_numbers = #tpu.dot_dimension_numbers<[1], [0], [0], [1], [0, 0, 1, 1], [], []>} : vector<4x32xf32>, vector<32x96xf32>, vector<4x96xf32> -> vector<4x96xf32>
    %200 = vector.extract_strided_slice %54 {offsets = [0, 0], sizes = [4, 64], strides = [1, 1]} : vector<4x96xf32> to vector<4x64xf32>
    %201 = vector.extract_strided_slice %199 {offsets = [0, 0], sizes = [4, 64], strides = [1, 1]} : vector<4x96xf32> to vector<4x64xf32>
    %202 = arith.addf %200, %201 : vector<4x64xf32>
    %203 = arith.negf %202 : vector<4x64xf32>
    %204 = math.exp %203 : vector<4x64xf32>
    %cst_43 = arith.constant 1.000000e+00 : f32
    %205 = vector.broadcast %cst_43 : f32 to vector<4x64xf32>
    %206 = arith.addf %205, %204 : vector<4x64xf32>
    %207 = arith.divf %205, %206 : vector<4x64xf32>
    %208 = vector.extract_strided_slice %207 {offsets = [0, 0], sizes = [4, 32], strides = [1, 1]} : vector<4x64xf32> to vector<4x32xf32>
    %209 = vector.extract_strided_slice %207 {offsets = [0, 32], sizes = [4, 32], strides = [1, 1]} : vector<4x64xf32> to vector<4x32xf32>
    %210 = vector.extract_strided_slice %54 {offsets = [0, 64], sizes = [4, 32], strides = [1, 1]} : vector<4x96xf32> to vector<4x32xf32>
    %211 = vector.extract_strided_slice %199 {offsets = [0, 64], sizes = [4, 32], strides = [1, 1]} : vector<4x96xf32> to vector<4x32xf32>
    %212 = vector.broadcast %19 : vector<1x32xf32> to vector<4x32xf32>
    %213 = arith.addf %211, %212 : vector<4x32xf32>
    %214 = arith.mulf %208, %213 : vector<4x32xf32>
    %215 = arith.addf %210, %214 : vector<4x32xf32>
    %216 = math.tanh %215 : vector<4x32xf32>
    %cst_44 = arith.constant 1.000000e+00 : f32
    %217 = vector.broadcast %cst_44 : f32 to vector<4x32xf32>
    %218 = arith.subf %217, %209 : vector<4x32xf32>
    %219 = arith.mulf %218, %216 : vector<4x32xf32>
    %220 = arith.mulf %209, %198 : vector<4x32xf32>
    %221 = arith.addf %219, %220 : vector<4x32xf32>
    %cst_45 = arith.constant dense<0.000000e+00> : vector<4x96xf32>
    %222 = tpu.matmul %221, %17, %cst_45 {dimension_numbers = #tpu.dot_dimension_numbers<[1], [0], [0], [1], [0, 0, 1, 1], [], []>} : vector<4x32xf32>, vector<32x96xf32>, vector<4x96xf32> -> vector<4x96xf32>
    %223 = vector.extract_strided_slice %59 {offsets = [0, 0], sizes = [4, 64], strides = [1, 1]} : vector<4x96xf32> to vector<4x64xf32>
    %224 = vector.extract_strided_slice %222 {offsets = [0, 0], sizes = [4, 64], strides = [1, 1]} : vector<4x96xf32> to vector<4x64xf32>
    %225 = arith.addf %223, %224 : vector<4x64xf32>
    %226 = arith.negf %225 : vector<4x64xf32>
    %227 = math.exp %226 : vector<4x64xf32>
    %cst_46 = arith.constant 1.000000e+00 : f32
    %228 = vector.broadcast %cst_46 : f32 to vector<4x64xf32>
    %229 = arith.addf %228, %227 : vector<4x64xf32>
    %230 = arith.divf %228, %229 : vector<4x64xf32>
    %231 = vector.extract_strided_slice %230 {offsets = [0, 0], sizes = [4, 32], strides = [1, 1]} : vector<4x64xf32> to vector<4x32xf32>
    %232 = vector.extract_strided_slice %230 {offsets = [0, 32], sizes = [4, 32], strides = [1, 1]} : vector<4x64xf32> to vector<4x32xf32>
    %233 = vector.extract_strided_slice %59 {offsets = [0, 64], sizes = [4, 32], strides = [1, 1]} : vector<4x96xf32> to vector<4x32xf32>
    %234 = vector.extract_strided_slice %222 {offsets = [0, 64], sizes = [4, 32], strides = [1, 1]} : vector<4x96xf32> to vector<4x32xf32>
    %235 = vector.broadcast %19 : vector<1x32xf32> to vector<4x32xf32>
    %236 = arith.addf %234, %235 : vector<4x32xf32>
    %237 = arith.mulf %231, %236 : vector<4x32xf32>
    %238 = arith.addf %233, %237 : vector<4x32xf32>
    %239 = math.tanh %238 : vector<4x32xf32>
    %cst_47 = arith.constant 1.000000e+00 : f32
    %240 = vector.broadcast %cst_47 : f32 to vector<4x32xf32>
    %241 = arith.subf %240, %232 : vector<4x32xf32>
    %242 = arith.mulf %241, %239 : vector<4x32xf32>
    %243 = arith.mulf %232, %221 : vector<4x32xf32>
    %244 = arith.addf %242, %243 : vector<4x32xf32>
    %c0_48 = arith.constant 0 : index
    %c0_49 = arith.constant 0 : index
    %245 = vector.load %arg5[%c0_48, %c0_49] : memref<32x96xf32, #tpu.memory_space<vmem>>, vector<32x96xf32>
    %c0_50 = arith.constant 0 : index
    %c0_51 = arith.constant 0 : index
    %246 = vector.load %arg6[%c0_50, %c0_51] : memref<32x96xf32, #tpu.memory_space<vmem>>, vector<32x96xf32>
    %c0_52 = arith.constant 0 : index
    %c0_53 = arith.constant 0 : index
    %247 = vector.load %arg7[%c0_52, %c0_53] : memref<1x96xf32, #tpu.memory_space<vmem>>, vector<1x96xf32>
    %c0_54 = arith.constant 0 : index
    %c0_55 = arith.constant 0 : index
    %248 = vector.load %arg8[%c0_54, %c0_55] : memref<1x32xf32, #tpu.memory_space<vmem>>, vector<1x32xf32>
    %cst_56 = arith.constant dense<0.000000e+00> : vector<4x96xf32>
    %249 = tpu.matmul %83, %245, %cst_56 {dimension_numbers = #tpu.dot_dimension_numbers<[1], [0], [0], [1], [0, 0, 1, 1], [], []>} : vector<4x32xf32>, vector<32x96xf32>, vector<4x96xf32> -> vector<4x96xf32>
    %250 = vector.broadcast %247 : vector<1x96xf32> to vector<4x96xf32>
    %251 = arith.addf %249, %250 : vector<4x96xf32>
    %cst_57 = arith.constant dense<0.000000e+00> : vector<4x96xf32>
    %252 = tpu.matmul %106, %245, %cst_57 {dimension_numbers = #tpu.dot_dimension_numbers<[1], [0], [0], [1], [0, 0, 1, 1], [], []>} : vector<4x32xf32>, vector<32x96xf32>, vector<4x96xf32> -> vector<4x96xf32>
    %253 = vector.broadcast %247 : vector<1x96xf32> to vector<4x96xf32>
    %254 = arith.addf %252, %253 : vector<4x96xf32>
    %cst_58 = arith.constant dense<0.000000e+00> : vector<4x96xf32>
    %255 = tpu.matmul %129, %245, %cst_58 {dimension_numbers = #tpu.dot_dimension_numbers<[1], [0], [0], [1], [0, 0, 1, 1], [], []>} : vector<4x32xf32>, vector<32x96xf32>, vector<4x96xf32> -> vector<4x96xf32>
    %256 = vector.broadcast %247 : vector<1x96xf32> to vector<4x96xf32>
    %257 = arith.addf %255, %256 : vector<4x96xf32>
    %cst_59 = arith.constant dense<0.000000e+00> : vector<4x96xf32>
    %258 = tpu.matmul %152, %245, %cst_59 {dimension_numbers = #tpu.dot_dimension_numbers<[1], [0], [0], [1], [0, 0, 1, 1], [], []>} : vector<4x32xf32>, vector<32x96xf32>, vector<4x96xf32> -> vector<4x96xf32>
    %259 = vector.broadcast %247 : vector<1x96xf32> to vector<4x96xf32>
    %260 = arith.addf %258, %259 : vector<4x96xf32>
    %cst_60 = arith.constant dense<0.000000e+00> : vector<4x96xf32>
    %261 = tpu.matmul %175, %245, %cst_60 {dimension_numbers = #tpu.dot_dimension_numbers<[1], [0], [0], [1], [0, 0, 1, 1], [], []>} : vector<4x32xf32>, vector<32x96xf32>, vector<4x96xf32> -> vector<4x96xf32>
    %262 = vector.broadcast %247 : vector<1x96xf32> to vector<4x96xf32>
    %263 = arith.addf %261, %262 : vector<4x96xf32>
    %cst_61 = arith.constant dense<0.000000e+00> : vector<4x96xf32>
    %264 = tpu.matmul %198, %245, %cst_61 {dimension_numbers = #tpu.dot_dimension_numbers<[1], [0], [0], [1], [0, 0, 1, 1], [], []>} : vector<4x32xf32>, vector<32x96xf32>, vector<4x96xf32> -> vector<4x96xf32>
    %265 = vector.broadcast %247 : vector<1x96xf32> to vector<4x96xf32>
    %266 = arith.addf %264, %265 : vector<4x96xf32>
    %cst_62 = arith.constant dense<0.000000e+00> : vector<4x96xf32>
    %267 = tpu.matmul %221, %245, %cst_62 {dimension_numbers = #tpu.dot_dimension_numbers<[1], [0], [0], [1], [0, 0, 1, 1], [], []>} : vector<4x32xf32>, vector<32x96xf32>, vector<4x96xf32> -> vector<4x96xf32>
    %268 = vector.broadcast %247 : vector<1x96xf32> to vector<4x96xf32>
    %269 = arith.addf %267, %268 : vector<4x96xf32>
    %cst_63 = arith.constant dense<0.000000e+00> : vector<4x96xf32>
    %270 = tpu.matmul %244, %245, %cst_63 {dimension_numbers = #tpu.dot_dimension_numbers<[1], [0], [0], [1], [0, 0, 1, 1], [], []>} : vector<4x32xf32>, vector<32x96xf32>, vector<4x96xf32> -> vector<4x96xf32>
    %271 = vector.broadcast %247 : vector<1x96xf32> to vector<4x96xf32>
    %272 = arith.addf %270, %271 : vector<4x96xf32>
    %cst_64 = arith.constant 0.000000e+00 : f32
    %273 = vector.broadcast %cst_64 : f32 to vector<4x32xf32>
    %cst_65 = arith.constant dense<0.000000e+00> : vector<4x96xf32>
    %274 = tpu.matmul %273, %246, %cst_65 {dimension_numbers = #tpu.dot_dimension_numbers<[1], [0], [0], [1], [0, 0, 1, 1], [], []>} : vector<4x32xf32>, vector<32x96xf32>, vector<4x96xf32> -> vector<4x96xf32>
    %275 = vector.extract_strided_slice %251 {offsets = [0, 0], sizes = [4, 64], strides = [1, 1]} : vector<4x96xf32> to vector<4x64xf32>
    %276 = vector.extract_strided_slice %274 {offsets = [0, 0], sizes = [4, 64], strides = [1, 1]} : vector<4x96xf32> to vector<4x64xf32>
    %277 = arith.addf %275, %276 : vector<4x64xf32>
    %278 = arith.negf %277 : vector<4x64xf32>
    %279 = math.exp %278 : vector<4x64xf32>
    %cst_66 = arith.constant 1.000000e+00 : f32
    %280 = vector.broadcast %cst_66 : f32 to vector<4x64xf32>
    %281 = arith.addf %280, %279 : vector<4x64xf32>
    %282 = arith.divf %280, %281 : vector<4x64xf32>
    %283 = vector.extract_strided_slice %282 {offsets = [0, 0], sizes = [4, 32], strides = [1, 1]} : vector<4x64xf32> to vector<4x32xf32>
    %284 = vector.extract_strided_slice %282 {offsets = [0, 32], sizes = [4, 32], strides = [1, 1]} : vector<4x64xf32> to vector<4x32xf32>
    %285 = vector.extract_strided_slice %251 {offsets = [0, 64], sizes = [4, 32], strides = [1, 1]} : vector<4x96xf32> to vector<4x32xf32>
    %286 = vector.extract_strided_slice %274 {offsets = [0, 64], sizes = [4, 32], strides = [1, 1]} : vector<4x96xf32> to vector<4x32xf32>
    %287 = vector.broadcast %248 : vector<1x32xf32> to vector<4x32xf32>
    %288 = arith.addf %286, %287 : vector<4x32xf32>
    %289 = arith.mulf %283, %288 : vector<4x32xf32>
    %290 = arith.addf %285, %289 : vector<4x32xf32>
    %291 = math.tanh %290 : vector<4x32xf32>
    %cst_67 = arith.constant 1.000000e+00 : f32
    %292 = vector.broadcast %cst_67 : f32 to vector<4x32xf32>
    %293 = arith.subf %292, %284 : vector<4x32xf32>
    %294 = arith.mulf %293, %291 : vector<4x32xf32>
    %295 = arith.mulf %284, %273 : vector<4x32xf32>
    %296 = arith.addf %294, %295 : vector<4x32xf32>
    %cst_68 = arith.constant dense<0.000000e+00> : vector<4x96xf32>
    %297 = tpu.matmul %296, %246, %cst_68 {dimension_numbers = #tpu.dot_dimension_numbers<[1], [0], [0], [1], [0, 0, 1, 1], [], []>} : vector<4x32xf32>, vector<32x96xf32>, vector<4x96xf32> -> vector<4x96xf32>
    %298 = vector.extract_strided_slice %254 {offsets = [0, 0], sizes = [4, 64], strides = [1, 1]} : vector<4x96xf32> to vector<4x64xf32>
    %299 = vector.extract_strided_slice %297 {offsets = [0, 0], sizes = [4, 64], strides = [1, 1]} : vector<4x96xf32> to vector<4x64xf32>
    %300 = arith.addf %298, %299 : vector<4x64xf32>
    %301 = arith.negf %300 : vector<4x64xf32>
    %302 = math.exp %301 : vector<4x64xf32>
    %cst_69 = arith.constant 1.000000e+00 : f32
    %303 = vector.broadcast %cst_69 : f32 to vector<4x64xf32>
    %304 = arith.addf %303, %302 : vector<4x64xf32>
    %305 = arith.divf %303, %304 : vector<4x64xf32>
    %306 = vector.extract_strided_slice %305 {offsets = [0, 0], sizes = [4, 32], strides = [1, 1]} : vector<4x64xf32> to vector<4x32xf32>
    %307 = vector.extract_strided_slice %305 {offsets = [0, 32], sizes = [4, 32], strides = [1, 1]} : vector<4x64xf32> to vector<4x32xf32>
    %308 = vector.extract_strided_slice %254 {offsets = [0, 64], sizes = [4, 32], strides = [1, 1]} : vector<4x96xf32> to vector<4x32xf32>
    %309 = vector.extract_strided_slice %297 {offsets = [0, 64], sizes = [4, 32], strides = [1, 1]} : vector<4x96xf32> to vector<4x32xf32>
    %310 = vector.broadcast %248 : vector<1x32xf32> to vector<4x32xf32>
    %311 = arith.addf %309, %310 : vector<4x32xf32>
    %312 = arith.mulf %306, %311 : vector<4x32xf32>
    %313 = arith.addf %308, %312 : vector<4x32xf32>
    %314 = math.tanh %313 : vector<4x32xf32>
    %cst_70 = arith.constant 1.000000e+00 : f32
    %315 = vector.broadcast %cst_70 : f32 to vector<4x32xf32>
    %316 = arith.subf %315, %307 : vector<4x32xf32>
    %317 = arith.mulf %316, %314 : vector<4x32xf32>
    %318 = arith.mulf %307, %296 : vector<4x32xf32>
    %319 = arith.addf %317, %318 : vector<4x32xf32>
    %cst_71 = arith.constant dense<0.000000e+00> : vector<4x96xf32>
    %320 = tpu.matmul %319, %246, %cst_71 {dimension_numbers = #tpu.dot_dimension_numbers<[1], [0], [0], [1], [0, 0, 1, 1], [], []>} : vector<4x32xf32>, vector<32x96xf32>, vector<4x96xf32> -> vector<4x96xf32>
    %321 = vector.extract_strided_slice %257 {offsets = [0, 0], sizes = [4, 64], strides = [1, 1]} : vector<4x96xf32> to vector<4x64xf32>
    %322 = vector.extract_strided_slice %320 {offsets = [0, 0], sizes = [4, 64], strides = [1, 1]} : vector<4x96xf32> to vector<4x64xf32>
    %323 = arith.addf %321, %322 : vector<4x64xf32>
    %324 = arith.negf %323 : vector<4x64xf32>
    %325 = math.exp %324 : vector<4x64xf32>
    %cst_72 = arith.constant 1.000000e+00 : f32
    %326 = vector.broadcast %cst_72 : f32 to vector<4x64xf32>
    %327 = arith.addf %326, %325 : vector<4x64xf32>
    %328 = arith.divf %326, %327 : vector<4x64xf32>
    %329 = vector.extract_strided_slice %328 {offsets = [0, 0], sizes = [4, 32], strides = [1, 1]} : vector<4x64xf32> to vector<4x32xf32>
    %330 = vector.extract_strided_slice %328 {offsets = [0, 32], sizes = [4, 32], strides = [1, 1]} : vector<4x64xf32> to vector<4x32xf32>
    %331 = vector.extract_strided_slice %257 {offsets = [0, 64], sizes = [4, 32], strides = [1, 1]} : vector<4x96xf32> to vector<4x32xf32>
    %332 = vector.extract_strided_slice %320 {offsets = [0, 64], sizes = [4, 32], strides = [1, 1]} : vector<4x96xf32> to vector<4x32xf32>
    %333 = vector.broadcast %248 : vector<1x32xf32> to vector<4x32xf32>
    %334 = arith.addf %332, %333 : vector<4x32xf32>
    %335 = arith.mulf %329, %334 : vector<4x32xf32>
    %336 = arith.addf %331, %335 : vector<4x32xf32>
    %337 = math.tanh %336 : vector<4x32xf32>
    %cst_73 = arith.constant 1.000000e+00 : f32
    %338 = vector.broadcast %cst_73 : f32 to vector<4x32xf32>
    %339 = arith.subf %338, %330 : vector<4x32xf32>
    %340 = arith.mulf %339, %337 : vector<4x32xf32>
    %341 = arith.mulf %330, %319 : vector<4x32xf32>
    %342 = arith.addf %340, %341 : vector<4x32xf32>
    %cst_74 = arith.constant dense<0.000000e+00> : vector<4x96xf32>
    %343 = tpu.matmul %342, %246, %cst_74 {dimension_numbers = #tpu.dot_dimension_numbers<[1], [0], [0], [1], [0, 0, 1, 1], [], []>} : vector<4x32xf32>, vector<32x96xf32>, vector<4x96xf32> -> vector<4x96xf32>
    %344 = vector.extract_strided_slice %260 {offsets = [0, 0], sizes = [4, 64], strides = [1, 1]} : vector<4x96xf32> to vector<4x64xf32>
    %345 = vector.extract_strided_slice %343 {offsets = [0, 0], sizes = [4, 64], strides = [1, 1]} : vector<4x96xf32> to vector<4x64xf32>
    %346 = arith.addf %344, %345 : vector<4x64xf32>
    %347 = arith.negf %346 : vector<4x64xf32>
    %348 = math.exp %347 : vector<4x64xf32>
    %cst_75 = arith.constant 1.000000e+00 : f32
    %349 = vector.broadcast %cst_75 : f32 to vector<4x64xf32>
    %350 = arith.addf %349, %348 : vector<4x64xf32>
    %351 = arith.divf %349, %350 : vector<4x64xf32>
    %352 = vector.extract_strided_slice %351 {offsets = [0, 0], sizes = [4, 32], strides = [1, 1]} : vector<4x64xf32> to vector<4x32xf32>
    %353 = vector.extract_strided_slice %351 {offsets = [0, 32], sizes = [4, 32], strides = [1, 1]} : vector<4x64xf32> to vector<4x32xf32>
    %354 = vector.extract_strided_slice %260 {offsets = [0, 64], sizes = [4, 32], strides = [1, 1]} : vector<4x96xf32> to vector<4x32xf32>
    %355 = vector.extract_strided_slice %343 {offsets = [0, 64], sizes = [4, 32], strides = [1, 1]} : vector<4x96xf32> to vector<4x32xf32>
    %356 = vector.broadcast %248 : vector<1x32xf32> to vector<4x32xf32>
    %357 = arith.addf %355, %356 : vector<4x32xf32>
    %358 = arith.mulf %352, %357 : vector<4x32xf32>
    %359 = arith.addf %354, %358 : vector<4x32xf32>
    %360 = math.tanh %359 : vector<4x32xf32>
    %cst_76 = arith.constant 1.000000e+00 : f32
    %361 = vector.broadcast %cst_76 : f32 to vector<4x32xf32>
    %362 = arith.subf %361, %353 : vector<4x32xf32>
    %363 = arith.mulf %362, %360 : vector<4x32xf32>
    %364 = arith.mulf %353, %342 : vector<4x32xf32>
    %365 = arith.addf %363, %364 : vector<4x32xf32>
    %cst_77 = arith.constant dense<0.000000e+00> : vector<4x96xf32>
    %366 = tpu.matmul %365, %246, %cst_77 {dimension_numbers = #tpu.dot_dimension_numbers<[1], [0], [0], [1], [0, 0, 1, 1], [], []>} : vector<4x32xf32>, vector<32x96xf32>, vector<4x96xf32> -> vector<4x96xf32>
    %367 = vector.extract_strided_slice %263 {offsets = [0, 0], sizes = [4, 64], strides = [1, 1]} : vector<4x96xf32> to vector<4x64xf32>
    %368 = vector.extract_strided_slice %366 {offsets = [0, 0], sizes = [4, 64], strides = [1, 1]} : vector<4x96xf32> to vector<4x64xf32>
    %369 = arith.addf %367, %368 : vector<4x64xf32>
    %370 = arith.negf %369 : vector<4x64xf32>
    %371 = math.exp %370 : vector<4x64xf32>
    %cst_78 = arith.constant 1.000000e+00 : f32
    %372 = vector.broadcast %cst_78 : f32 to vector<4x64xf32>
    %373 = arith.addf %372, %371 : vector<4x64xf32>
    %374 = arith.divf %372, %373 : vector<4x64xf32>
    %375 = vector.extract_strided_slice %374 {offsets = [0, 0], sizes = [4, 32], strides = [1, 1]} : vector<4x64xf32> to vector<4x32xf32>
    %376 = vector.extract_strided_slice %374 {offsets = [0, 32], sizes = [4, 32], strides = [1, 1]} : vector<4x64xf32> to vector<4x32xf32>
    %377 = vector.extract_strided_slice %263 {offsets = [0, 64], sizes = [4, 32], strides = [1, 1]} : vector<4x96xf32> to vector<4x32xf32>
    %378 = vector.extract_strided_slice %366 {offsets = [0, 64], sizes = [4, 32], strides = [1, 1]} : vector<4x96xf32> to vector<4x32xf32>
    %379 = vector.broadcast %248 : vector<1x32xf32> to vector<4x32xf32>
    %380 = arith.addf %378, %379 : vector<4x32xf32>
    %381 = arith.mulf %375, %380 : vector<4x32xf32>
    %382 = arith.addf %377, %381 : vector<4x32xf32>
    %383 = math.tanh %382 : vector<4x32xf32>
    %cst_79 = arith.constant 1.000000e+00 : f32
    %384 = vector.broadcast %cst_79 : f32 to vector<4x32xf32>
    %385 = arith.subf %384, %376 : vector<4x32xf32>
    %386 = arith.mulf %385, %383 : vector<4x32xf32>
    %387 = arith.mulf %376, %365 : vector<4x32xf32>
    %388 = arith.addf %386, %387 : vector<4x32xf32>
    %cst_80 = arith.constant dense<0.000000e+00> : vector<4x96xf32>
    %389 = tpu.matmul %388, %246, %cst_80 {dimension_numbers = #tpu.dot_dimension_numbers<[1], [0], [0], [1], [0, 0, 1, 1], [], []>} : vector<4x32xf32>, vector<32x96xf32>, vector<4x96xf32> -> vector<4x96xf32>
    %390 = vector.extract_strided_slice %266 {offsets = [0, 0], sizes = [4, 64], strides = [1, 1]} : vector<4x96xf32> to vector<4x64xf32>
    %391 = vector.extract_strided_slice %389 {offsets = [0, 0], sizes = [4, 64], strides = [1, 1]} : vector<4x96xf32> to vector<4x64xf32>
    %392 = arith.addf %390, %391 : vector<4x64xf32>
    %393 = arith.negf %392 : vector<4x64xf32>
    %394 = math.exp %393 : vector<4x64xf32>
    %cst_81 = arith.constant 1.000000e+00 : f32
    %395 = vector.broadcast %cst_81 : f32 to vector<4x64xf32>
    %396 = arith.addf %395, %394 : vector<4x64xf32>
    %397 = arith.divf %395, %396 : vector<4x64xf32>
    %398 = vector.extract_strided_slice %397 {offsets = [0, 0], sizes = [4, 32], strides = [1, 1]} : vector<4x64xf32> to vector<4x32xf32>
    %399 = vector.extract_strided_slice %397 {offsets = [0, 32], sizes = [4, 32], strides = [1, 1]} : vector<4x64xf32> to vector<4x32xf32>
    %400 = vector.extract_strided_slice %266 {offsets = [0, 64], sizes = [4, 32], strides = [1, 1]} : vector<4x96xf32> to vector<4x32xf32>
    %401 = vector.extract_strided_slice %389 {offsets = [0, 64], sizes = [4, 32], strides = [1, 1]} : vector<4x96xf32> to vector<4x32xf32>
    %402 = vector.broadcast %248 : vector<1x32xf32> to vector<4x32xf32>
    %403 = arith.addf %401, %402 : vector<4x32xf32>
    %404 = arith.mulf %398, %403 : vector<4x32xf32>
    %405 = arith.addf %400, %404 : vector<4x32xf32>
    %406 = math.tanh %405 : vector<4x32xf32>
    %cst_82 = arith.constant 1.000000e+00 : f32
    %407 = vector.broadcast %cst_82 : f32 to vector<4x32xf32>
    %408 = arith.subf %407, %399 : vector<4x32xf32>
    %409 = arith.mulf %408, %406 : vector<4x32xf32>
    %410 = arith.mulf %399, %388 : vector<4x32xf32>
    %411 = arith.addf %409, %410 : vector<4x32xf32>
    %cst_83 = arith.constant dense<0.000000e+00> : vector<4x96xf32>
    %412 = tpu.matmul %411, %246, %cst_83 {dimension_numbers = #tpu.dot_dimension_numbers<[1], [0], [0], [1], [0, 0, 1, 1], [], []>} : vector<4x32xf32>, vector<32x96xf32>, vector<4x96xf32> -> vector<4x96xf32>
    %413 = vector.extract_strided_slice %269 {offsets = [0, 0], sizes = [4, 64], strides = [1, 1]} : vector<4x96xf32> to vector<4x64xf32>
    %414 = vector.extract_strided_slice %412 {offsets = [0, 0], sizes = [4, 64], strides = [1, 1]} : vector<4x96xf32> to vector<4x64xf32>
    %415 = arith.addf %413, %414 : vector<4x64xf32>
    %416 = arith.negf %415 : vector<4x64xf32>
    %417 = math.exp %416 : vector<4x64xf32>
    %cst_84 = arith.constant 1.000000e+00 : f32
    %418 = vector.broadcast %cst_84 : f32 to vector<4x64xf32>
    %419 = arith.addf %418, %417 : vector<4x64xf32>
    %420 = arith.divf %418, %419 : vector<4x64xf32>
    %421 = vector.extract_strided_slice %420 {offsets = [0, 0], sizes = [4, 32], strides = [1, 1]} : vector<4x64xf32> to vector<4x32xf32>
    %422 = vector.extract_strided_slice %420 {offsets = [0, 32], sizes = [4, 32], strides = [1, 1]} : vector<4x64xf32> to vector<4x32xf32>
    %423 = vector.extract_strided_slice %269 {offsets = [0, 64], sizes = [4, 32], strides = [1, 1]} : vector<4x96xf32> to vector<4x32xf32>
    %424 = vector.extract_strided_slice %412 {offsets = [0, 64], sizes = [4, 32], strides = [1, 1]} : vector<4x96xf32> to vector<4x32xf32>
    %425 = vector.broadcast %248 : vector<1x32xf32> to vector<4x32xf32>
    %426 = arith.addf %424, %425 : vector<4x32xf32>
    %427 = arith.mulf %421, %426 : vector<4x32xf32>
    %428 = arith.addf %423, %427 : vector<4x32xf32>
    %429 = math.tanh %428 : vector<4x32xf32>
    %cst_85 = arith.constant 1.000000e+00 : f32
    %430 = vector.broadcast %cst_85 : f32 to vector<4x32xf32>
    %431 = arith.subf %430, %422 : vector<4x32xf32>
    %432 = arith.mulf %431, %429 : vector<4x32xf32>
    %433 = arith.mulf %422, %411 : vector<4x32xf32>
    %434 = arith.addf %432, %433 : vector<4x32xf32>
    %cst_86 = arith.constant dense<0.000000e+00> : vector<4x96xf32>
    %435 = tpu.matmul %434, %246, %cst_86 {dimension_numbers = #tpu.dot_dimension_numbers<[1], [0], [0], [1], [0, 0, 1, 1], [], []>} : vector<4x32xf32>, vector<32x96xf32>, vector<4x96xf32> -> vector<4x96xf32>
    %436 = vector.extract_strided_slice %272 {offsets = [0, 0], sizes = [4, 64], strides = [1, 1]} : vector<4x96xf32> to vector<4x64xf32>
    %437 = vector.extract_strided_slice %435 {offsets = [0, 0], sizes = [4, 64], strides = [1, 1]} : vector<4x96xf32> to vector<4x64xf32>
    %438 = arith.addf %436, %437 : vector<4x64xf32>
    %439 = arith.negf %438 : vector<4x64xf32>
    %440 = math.exp %439 : vector<4x64xf32>
    %cst_87 = arith.constant 1.000000e+00 : f32
    %441 = vector.broadcast %cst_87 : f32 to vector<4x64xf32>
    %442 = arith.addf %441, %440 : vector<4x64xf32>
    %443 = arith.divf %441, %442 : vector<4x64xf32>
    %444 = vector.extract_strided_slice %443 {offsets = [0, 0], sizes = [4, 32], strides = [1, 1]} : vector<4x64xf32> to vector<4x32xf32>
    %445 = vector.extract_strided_slice %443 {offsets = [0, 32], sizes = [4, 32], strides = [1, 1]} : vector<4x64xf32> to vector<4x32xf32>
    %446 = vector.extract_strided_slice %272 {offsets = [0, 64], sizes = [4, 32], strides = [1, 1]} : vector<4x96xf32> to vector<4x32xf32>
    %447 = vector.extract_strided_slice %435 {offsets = [0, 64], sizes = [4, 32], strides = [1, 1]} : vector<4x96xf32> to vector<4x32xf32>
    %448 = vector.broadcast %248 : vector<1x32xf32> to vector<4x32xf32>
    %449 = arith.addf %447, %448 : vector<4x32xf32>
    %450 = arith.mulf %444, %449 : vector<4x32xf32>
    %451 = arith.addf %446, %450 : vector<4x32xf32>
    %452 = math.tanh %451 : vector<4x32xf32>
    %cst_88 = arith.constant 1.000000e+00 : f32
    %453 = vector.broadcast %cst_88 : f32 to vector<4x32xf32>
    %454 = arith.subf %453, %445 : vector<4x32xf32>
    %455 = arith.mulf %454, %452 : vector<4x32xf32>
    %456 = arith.mulf %445, %434 : vector<4x32xf32>
    %457 = arith.addf %455, %456 : vector<4x32xf32>
    %c0_89 = arith.constant 0 : index
    %c0_90 = arith.constant 0 : index
    %458 = vector.load %arg9[%c0_89, %c0_90] : memref<32x4xf32, #tpu.memory_space<vmem>>, vector<32x4xf32>
    %c0_91 = arith.constant 0 : index
    %c0_92 = arith.constant 0 : index
    %459 = vector.load %arg10[%c0_91, %c0_92] : memref<1x4xf32, #tpu.memory_space<vmem>>, vector<1x4xf32>
    %c0_93 = arith.constant 0 : index
    %c0_94 = arith.constant 0 : index
    %460 = vector.load %arg11[%c0_93, %c0_94] : memref<32x4xf32, #tpu.memory_space<vmem>>, vector<32x4xf32>
    %c0_95 = arith.constant 0 : index
    %c0_96 = arith.constant 0 : index
    %461 = vector.load %arg12[%c0_95, %c0_96] : memref<1x4xf32, #tpu.memory_space<vmem>>, vector<1x4xf32>
    %c0_97 = arith.constant 0 : index
    %c0_98 = arith.constant 0 : index
    %462 = vector.load %arg13[%c0_97, %c0_98] : memref<32x32xf32, #tpu.memory_space<vmem>>, vector<32x32xf32>
    %c0_99 = arith.constant 0 : index
    %c0_100 = arith.constant 0 : index
    %463 = vector.load %arg14[%c0_99, %c0_100] : memref<1x32xf32, #tpu.memory_space<vmem>>, vector<1x32xf32>
    %c0_101 = arith.constant 0 : index
    %c0_102 = arith.constant 0 : index
    %464 = vector.load %arg15[%c0_101, %c0_102] : memref<32x4xf32, #tpu.memory_space<vmem>>, vector<32x4xf32>
    %c0_103 = arith.constant 0 : index
    %c0_104 = arith.constant 0 : index
    %465 = vector.load %arg16[%c0_103, %c0_104] : memref<1x4xf32, #tpu.memory_space<vmem>>, vector<1x4xf32>
    %cst_105 = arith.constant dense<0.000000e+00> : vector<4x4xf32>
    %466 = tpu.matmul %457, %458, %cst_105 {dimension_numbers = #tpu.dot_dimension_numbers<[1], [0], [0], [1], [0, 0, 1, 1], [], []>} : vector<4x32xf32>, vector<32x4xf32>, vector<4x4xf32> -> vector<4x4xf32>
    %467 = vector.broadcast %459 : vector<1x4xf32> to vector<4x4xf32>
    %468 = arith.addf %466, %467 : vector<4x4xf32>
    %cst_106 = arith.constant dense<0.000000e+00> : vector<4x4xf32>
    %469 = tpu.matmul %296, %460, %cst_106 {dimension_numbers = #tpu.dot_dimension_numbers<[1], [0], [0], [1], [0, 0, 1, 1], [], []>} : vector<4x32xf32>, vector<32x4xf32>, vector<4x4xf32> -> vector<4x4xf32>
    %470 = vector.broadcast %461 : vector<1x4xf32> to vector<4x4xf32>
    %471 = arith.addf %469, %470 : vector<4x4xf32>
    %cst_107 = arith.constant dense<0.000000e+00> : vector<4x4xf32>
    %472 = tpu.matmul %319, %460, %cst_107 {dimension_numbers = #tpu.dot_dimension_numbers<[1], [0], [0], [1], [0, 0, 1, 1], [], []>} : vector<4x32xf32>, vector<32x4xf32>, vector<4x4xf32> -> vector<4x4xf32>
    %473 = vector.broadcast %461 : vector<1x4xf32> to vector<4x4xf32>
    %474 = arith.addf %472, %473 : vector<4x4xf32>
    %cst_108 = arith.constant dense<0.000000e+00> : vector<4x4xf32>
    %475 = tpu.matmul %342, %460, %cst_108 {dimension_numbers = #tpu.dot_dimension_numbers<[1], [0], [0], [1], [0, 0, 1, 1], [], []>} : vector<4x32xf32>, vector<32x4xf32>, vector<4x4xf32> -> vector<4x4xf32>
    %476 = vector.broadcast %461 : vector<1x4xf32> to vector<4x4xf32>
    %477 = arith.addf %475, %476 : vector<4x4xf32>
    %cst_109 = arith.constant dense<0.000000e+00> : vector<4x4xf32>
    %478 = tpu.matmul %365, %460, %cst_109 {dimension_numbers = #tpu.dot_dimension_numbers<[1], [0], [0], [1], [0, 0, 1, 1], [], []>} : vector<4x32xf32>, vector<32x4xf32>, vector<4x4xf32> -> vector<4x4xf32>
    %479 = vector.broadcast %461 : vector<1x4xf32> to vector<4x4xf32>
    %480 = arith.addf %478, %479 : vector<4x4xf32>
    %cst_110 = arith.constant dense<0.000000e+00> : vector<4x4xf32>
    %481 = tpu.matmul %388, %460, %cst_110 {dimension_numbers = #tpu.dot_dimension_numbers<[1], [0], [0], [1], [0, 0, 1, 1], [], []>} : vector<4x32xf32>, vector<32x4xf32>, vector<4x4xf32> -> vector<4x4xf32>
    %482 = vector.broadcast %461 : vector<1x4xf32> to vector<4x4xf32>
    %483 = arith.addf %481, %482 : vector<4x4xf32>
    %cst_111 = arith.constant dense<0.000000e+00> : vector<4x4xf32>
    %484 = tpu.matmul %411, %460, %cst_111 {dimension_numbers = #tpu.dot_dimension_numbers<[1], [0], [0], [1], [0, 0, 1, 1], [], []>} : vector<4x32xf32>, vector<32x4xf32>, vector<4x4xf32> -> vector<4x4xf32>
    %485 = vector.broadcast %461 : vector<1x4xf32> to vector<4x4xf32>
    %486 = arith.addf %484, %485 : vector<4x4xf32>
    %cst_112 = arith.constant dense<0.000000e+00> : vector<4x4xf32>
    %487 = tpu.matmul %434, %460, %cst_112 {dimension_numbers = #tpu.dot_dimension_numbers<[1], [0], [0], [1], [0, 0, 1, 1], [], []>} : vector<4x32xf32>, vector<32x4xf32>, vector<4x4xf32> -> vector<4x4xf32>
    %488 = vector.broadcast %461 : vector<1x4xf32> to vector<4x4xf32>
    %489 = arith.addf %487, %488 : vector<4x4xf32>
    %cst_113 = arith.constant dense<0.000000e+00> : vector<4x4xf32>
    %490 = tpu.matmul %457, %460, %cst_113 {dimension_numbers = #tpu.dot_dimension_numbers<[1], [0], [0], [1], [0, 0, 1, 1], [], []>} : vector<4x32xf32>, vector<32x4xf32>, vector<4x4xf32> -> vector<4x4xf32>
    %491 = vector.broadcast %461 : vector<1x4xf32> to vector<4x4xf32>
    %492 = arith.addf %490, %491 : vector<4x4xf32>
    %cst_114 = arith.constant dense<0.000000e+00> : vector<4x32xf32>
    %493 = tpu.matmul %296, %462, %cst_114 {dimension_numbers = #tpu.dot_dimension_numbers<[1], [0], [0], [1], [0, 0, 1, 1], [], []>} : vector<4x32xf32>, vector<32x32xf32>, vector<4x32xf32> -> vector<4x32xf32>
    %494 = vector.broadcast %463 : vector<1x32xf32> to vector<4x32xf32>
    %495 = arith.addf %493, %494 : vector<4x32xf32>
    %cst_115 = arith.constant dense<0.000000e+00> : vector<4x32xf32>
    %496 = tpu.matmul %319, %462, %cst_115 {dimension_numbers = #tpu.dot_dimension_numbers<[1], [0], [0], [1], [0, 0, 1, 1], [], []>} : vector<4x32xf32>, vector<32x32xf32>, vector<4x32xf32> -> vector<4x32xf32>
    %497 = vector.broadcast %463 : vector<1x32xf32> to vector<4x32xf32>
    %498 = arith.addf %496, %497 : vector<4x32xf32>
    %cst_116 = arith.constant dense<0.000000e+00> : vector<4x32xf32>
    %499 = tpu.matmul %342, %462, %cst_116 {dimension_numbers = #tpu.dot_dimension_numbers<[1], [0], [0], [1], [0, 0, 1, 1], [], []>} : vector<4x32xf32>, vector<32x32xf32>, vector<4x32xf32> -> vector<4x32xf32>
    %500 = vector.broadcast %463 : vector<1x32xf32> to vector<4x32xf32>
    %501 = arith.addf %499, %500 : vector<4x32xf32>
    %cst_117 = arith.constant dense<0.000000e+00> : vector<4x32xf32>
    %502 = tpu.matmul %365, %462, %cst_117 {dimension_numbers = #tpu.dot_dimension_numbers<[1], [0], [0], [1], [0, 0, 1, 1], [], []>} : vector<4x32xf32>, vector<32x32xf32>, vector<4x32xf32> -> vector<4x32xf32>
    %503 = vector.broadcast %463 : vector<1x32xf32> to vector<4x32xf32>
    %504 = arith.addf %502, %503 : vector<4x32xf32>
    %cst_118 = arith.constant dense<0.000000e+00> : vector<4x32xf32>
    %505 = tpu.matmul %388, %462, %cst_118 {dimension_numbers = #tpu.dot_dimension_numbers<[1], [0], [0], [1], [0, 0, 1, 1], [], []>} : vector<4x32xf32>, vector<32x32xf32>, vector<4x32xf32> -> vector<4x32xf32>
    %506 = vector.broadcast %463 : vector<1x32xf32> to vector<4x32xf32>
    %507 = arith.addf %505, %506 : vector<4x32xf32>
    %cst_119 = arith.constant dense<0.000000e+00> : vector<4x32xf32>
    %508 = tpu.matmul %411, %462, %cst_119 {dimension_numbers = #tpu.dot_dimension_numbers<[1], [0], [0], [1], [0, 0, 1, 1], [], []>} : vector<4x32xf32>, vector<32x32xf32>, vector<4x32xf32> -> vector<4x32xf32>
    %509 = vector.broadcast %463 : vector<1x32xf32> to vector<4x32xf32>
    %510 = arith.addf %508, %509 : vector<4x32xf32>
    %cst_120 = arith.constant dense<0.000000e+00> : vector<4x32xf32>
    %511 = tpu.matmul %434, %462, %cst_120 {dimension_numbers = #tpu.dot_dimension_numbers<[1], [0], [0], [1], [0, 0, 1, 1], [], []>} : vector<4x32xf32>, vector<32x32xf32>, vector<4x32xf32> -> vector<4x32xf32>
    %512 = vector.broadcast %463 : vector<1x32xf32> to vector<4x32xf32>
    %513 = arith.addf %511, %512 : vector<4x32xf32>
    %cst_121 = arith.constant dense<0.000000e+00> : vector<4x32xf32>
    %514 = tpu.matmul %457, %462, %cst_121 {dimension_numbers = #tpu.dot_dimension_numbers<[1], [0], [0], [1], [0, 0, 1, 1], [], []>} : vector<4x32xf32>, vector<32x32xf32>, vector<4x32xf32> -> vector<4x32xf32>
    %515 = vector.broadcast %463 : vector<1x32xf32> to vector<4x32xf32>
    %516 = arith.addf %514, %515 : vector<4x32xf32>
    %517 = arith.mulf %468, %471 : vector<4x4xf32>
    %cst_122 = arith.constant dense<0.000000e+00> : vector<4xf32>
    %518 = vector.multi_reduction <add>, %517, %cst_122 [1] : vector<4x4xf32> to vector<4xf32>
    %519 = vector.shape_cast %518 : vector<4xf32> to vector<4x1xf32>
    %cst_123 = arith.constant 5.000000e-01 : f32
    %520 = vector.broadcast %cst_123 : f32 to vector<4x1xf32>
    %521 = arith.mulf %519, %520 : vector<4x1xf32>
    %522 = arith.mulf %468, %474 : vector<4x4xf32>
    %cst_124 = arith.constant dense<0.000000e+00> : vector<4xf32>
    %523 = vector.multi_reduction <add>, %522, %cst_124 [1] : vector<4x4xf32> to vector<4xf32>
    %524 = vector.shape_cast %523 : vector<4xf32> to vector<4x1xf32>
    %cst_125 = arith.constant 5.000000e-01 : f32
    %525 = vector.broadcast %cst_125 : f32 to vector<4x1xf32>
    %526 = arith.mulf %524, %525 : vector<4x1xf32>
    %527 = arith.mulf %468, %477 : vector<4x4xf32>
    %cst_126 = arith.constant dense<0.000000e+00> : vector<4xf32>
    %528 = vector.multi_reduction <add>, %527, %cst_126 [1] : vector<4x4xf32> to vector<4xf32>
    %529 = vector.shape_cast %528 : vector<4xf32> to vector<4x1xf32>
    %cst_127 = arith.constant 5.000000e-01 : f32
    %530 = vector.broadcast %cst_127 : f32 to vector<4x1xf32>
    %531 = arith.mulf %529, %530 : vector<4x1xf32>
    %532 = arith.mulf %468, %480 : vector<4x4xf32>
    %cst_128 = arith.constant dense<0.000000e+00> : vector<4xf32>
    %533 = vector.multi_reduction <add>, %532, %cst_128 [1] : vector<4x4xf32> to vector<4xf32>
    %534 = vector.shape_cast %533 : vector<4xf32> to vector<4x1xf32>
    %cst_129 = arith.constant 5.000000e-01 : f32
    %535 = vector.broadcast %cst_129 : f32 to vector<4x1xf32>
    %536 = arith.mulf %534, %535 : vector<4x1xf32>
    %537 = arith.mulf %468, %483 : vector<4x4xf32>
    %cst_130 = arith.constant dense<0.000000e+00> : vector<4xf32>
    %538 = vector.multi_reduction <add>, %537, %cst_130 [1] : vector<4x4xf32> to vector<4xf32>
    %539 = vector.shape_cast %538 : vector<4xf32> to vector<4x1xf32>
    %cst_131 = arith.constant 5.000000e-01 : f32
    %540 = vector.broadcast %cst_131 : f32 to vector<4x1xf32>
    %541 = arith.mulf %539, %540 : vector<4x1xf32>
    %542 = arith.mulf %468, %486 : vector<4x4xf32>
    %cst_132 = arith.constant dense<0.000000e+00> : vector<4xf32>
    %543 = vector.multi_reduction <add>, %542, %cst_132 [1] : vector<4x4xf32> to vector<4xf32>
    %544 = vector.shape_cast %543 : vector<4xf32> to vector<4x1xf32>
    %cst_133 = arith.constant 5.000000e-01 : f32
    %545 = vector.broadcast %cst_133 : f32 to vector<4x1xf32>
    %546 = arith.mulf %544, %545 : vector<4x1xf32>
    %547 = arith.mulf %468, %489 : vector<4x4xf32>
    %cst_134 = arith.constant dense<0.000000e+00> : vector<4xf32>
    %548 = vector.multi_reduction <add>, %547, %cst_134 [1] : vector<4x4xf32> to vector<4xf32>
    %549 = vector.shape_cast %548 : vector<4xf32> to vector<4x1xf32>
    %cst_135 = arith.constant 5.000000e-01 : f32
    %550 = vector.broadcast %cst_135 : f32 to vector<4x1xf32>
    %551 = arith.mulf %549, %550 : vector<4x1xf32>
    %552 = arith.mulf %468, %492 : vector<4x4xf32>
    %cst_136 = arith.constant dense<0.000000e+00> : vector<4xf32>
    %553 = vector.multi_reduction <add>, %552, %cst_136 [1] : vector<4x4xf32> to vector<4xf32>
    %554 = vector.shape_cast %553 : vector<4xf32> to vector<4x1xf32>
    %cst_137 = arith.constant 5.000000e-01 : f32
    %555 = vector.broadcast %cst_137 : f32 to vector<4x1xf32>
    %556 = arith.mulf %554, %555 : vector<4x1xf32>
    %557 = arith.maximumf %521, %526 : vector<4x1xf32>
    %558 = arith.maximumf %557, %531 : vector<4x1xf32>
    %559 = arith.maximumf %558, %536 : vector<4x1xf32>
    %560 = arith.maximumf %559, %541 : vector<4x1xf32>
    %561 = arith.maximumf %560, %546 : vector<4x1xf32>
    %562 = arith.maximumf %561, %551 : vector<4x1xf32>
    %563 = arith.maximumf %562, %556 : vector<4x1xf32>
    %564 = arith.subf %521, %563 : vector<4x1xf32>
    %565 = math.exp %564 : vector<4x1xf32>
    %566 = arith.subf %526, %563 : vector<4x1xf32>
    %567 = math.exp %566 : vector<4x1xf32>
    %568 = arith.subf %531, %563 : vector<4x1xf32>
    %569 = math.exp %568 : vector<4x1xf32>
    %570 = arith.subf %536, %563 : vector<4x1xf32>
    %571 = math.exp %570 : vector<4x1xf32>
    %572 = arith.subf %541, %563 : vector<4x1xf32>
    %573 = math.exp %572 : vector<4x1xf32>
    %574 = arith.subf %546, %563 : vector<4x1xf32>
    %575 = math.exp %574 : vector<4x1xf32>
    %576 = arith.subf %551, %563 : vector<4x1xf32>
    %577 = math.exp %576 : vector<4x1xf32>
    %578 = arith.subf %556, %563 : vector<4x1xf32>
    %579 = math.exp %578 : vector<4x1xf32>
    %580 = arith.addf %565, %567 : vector<4x1xf32>
    %581 = arith.addf %580, %569 : vector<4x1xf32>
    %582 = arith.addf %581, %571 : vector<4x1xf32>
    %583 = arith.addf %582, %573 : vector<4x1xf32>
    %584 = arith.addf %583, %575 : vector<4x1xf32>
    %585 = arith.addf %584, %577 : vector<4x1xf32>
    %586 = arith.addf %585, %579 : vector<4x1xf32>
    %587 = tpu.reciprocal %586 {approx = true} : vector<4x1xf32> -> vector<4x1xf32>
    %588 = arith.mulf %565, %587 : vector<4x1xf32>
    %589 = vector.broadcast %588 : vector<4x1xf32> to vector<4x32xf32>
    %590 = arith.mulf %589, %495 : vector<4x32xf32>
    %591 = arith.mulf %567, %587 : vector<4x1xf32>
    %592 = vector.broadcast %591 : vector<4x1xf32> to vector<4x32xf32>
    %593 = arith.mulf %592, %498 : vector<4x32xf32>
    %594 = arith.addf %590, %593 : vector<4x32xf32>
    %595 = arith.mulf %569, %587 : vector<4x1xf32>
    %596 = vector.broadcast %595 : vector<4x1xf32> to vector<4x32xf32>
    %597 = arith.mulf %596, %501 : vector<4x32xf32>
    %598 = arith.addf %594, %597 : vector<4x32xf32>
    %599 = arith.mulf %571, %587 : vector<4x1xf32>
    %600 = vector.broadcast %599 : vector<4x1xf32> to vector<4x32xf32>
    %601 = arith.mulf %600, %504 : vector<4x32xf32>
    %602 = arith.addf %598, %601 : vector<4x32xf32>
    %603 = arith.mulf %573, %587 : vector<4x1xf32>
    %604 = vector.broadcast %603 : vector<4x1xf32> to vector<4x32xf32>
    %605 = arith.mulf %604, %507 : vector<4x32xf32>
    %606 = arith.addf %602, %605 : vector<4x32xf32>
    %607 = arith.mulf %575, %587 : vector<4x1xf32>
    %608 = vector.broadcast %607 : vector<4x1xf32> to vector<4x32xf32>
    %609 = arith.mulf %608, %510 : vector<4x32xf32>
    %610 = arith.addf %606, %609 : vector<4x32xf32>
    %611 = arith.mulf %577, %587 : vector<4x1xf32>
    %612 = vector.broadcast %611 : vector<4x1xf32> to vector<4x32xf32>
    %613 = arith.mulf %612, %513 : vector<4x32xf32>
    %614 = arith.addf %610, %613 : vector<4x32xf32>
    %615 = arith.mulf %579, %587 : vector<4x1xf32>
    %616 = vector.broadcast %615 : vector<4x1xf32> to vector<4x32xf32>
    %617 = arith.mulf %616, %516 : vector<4x32xf32>
    %618 = arith.addf %614, %617 : vector<4x32xf32>
    %cst_138 = arith.constant dense<0.000000e+00> : vector<4x4xf32>
    %619 = tpu.matmul %618, %464, %cst_138 {dimension_numbers = #tpu.dot_dimension_numbers<[1], [0], [0], [1], [0, 0, 1, 1], [], []>} : vector<4x32xf32>, vector<32x4xf32>, vector<4x4xf32> -> vector<4x4xf32>
    %620 = vector.broadcast %465 : vector<1x4xf32> to vector<4x4xf32>
    %621 = arith.addf %619, %620 : vector<4x4xf32>
    %c0_139 = arith.constant 0 : index
    %c0_140 = arith.constant 0 : index
    %622 = vector.load %arg17[%c0_139, %c0_140] : memref<4x4xf32, #tpu.memory_space<vmem>>, vector<4x4xf32>
    tpu.vector_store %arg17[%c0_139, %c0_140], %621 {strides = array<i32>} : memref<4x4xf32, #tpu.memory_space<vmem>>, vector<4x4xf32>,
    return
  }
}

</mosaic_0001>

<bundles_post_ra>
// kernel: tpu_custom_call.1
= control target key start
LH: loop header
LB: loop body
LE: loop exit
PB: predicated region body
PF: predicated region fallthrough
CT: control target
= control target key end

     0   :  { %s2743_s0 = inlined_call_operand.vmem [shape: f32[8,4,1], index: 0, kind: input, shape index: {}]   ;;  %s2744_s1 = inlined_call_operand.vmem [shape: f32[1,96], index: 1, kind: input, shape index: {}]   ;;  %s2745_s2 = inlined_call_operand.vmem [shape: f32[32,96], index: 2, kind: input, shape index: {}]   ;;  %s2746_s3 = inlined_call_operand.vmem [shape: f32[1,96], index: 3, kind: input, shape index: {}]   ;;  %s2747_s4 = inlined_call_operand.vmem [shape: f32[1,32], index: 4, kind: input, shape index: {}]   ;;  %s2748_s5 = inlined_call_operand.vmem [shape: f32[32,96], index: 5, kind: input, shape index: {}]   ;;  %s2749_s6 = inlined_call_operand.vmem [shape: f32[32,96], index: 6, kind: input, shape index: {}]   ;;  %s2750_s7 = inlined_call_operand.vmem [shape: f32[1,96], index: 7, kind: input, shape index: {}]   ;;  %s2751_s8 = inlined_call_operand.vmem [shape: f32[1,32], index: 8, kind: input, shape index: {}]   ;;  %s2752_s9 = inlined_call_operand.vmem [shape: f32[32,4], index: 9, kind: input, shape index: {}]   ;;  %s2753_s10 = inlined_call_operand.vmem [shape: f32[1,4], index: 10, kind: input, shape index: {}]   ;;  %s2754_s11 = inlined_call_operand.vmem [shape: f32[32,4], index: 11, kind: input, shape index: {}]   ;;  %s2755_s12 = inlined_call_operand.vmem [shape: f32[1,4], index: 12, kind: input, shape index: {}]   ;;  %s2756_s13 = inlined_call_operand.vmem [shape: f32[32,32], index: 13, kind: input, shape index: {}]   ;;  %s2757_s14 = inlined_call_operand.vmem [shape: f32[1,32], index: 14, kind: input, shape index: {}]   ;;  %s2758_s15 = inlined_call_operand.vmem [shape: f32[32,4], index: 15, kind: input, shape index: {}]   ;;  %s2759_s16 = inlined_call_operand.vmem [shape: f32[1,4], index: 16, kind: input, shape index: {}]   ;;  %s2760_s17 = inlined_call_operand.hbm [shape: f32[4,4], index: 17, kind: output, shape index: {}]  }
   0x1   :  { %2762 = sst [smem:[#allocation5_spill]] %s2743_s0 }
   0x2   :  { %2763 = sst [smem:[#allocation6_spill]] %s2744_s1 }
   0x3   :  { %v76_v0 = vld [vmem:[%s2745_s2 + $0x18] sm:$0xff]  ;;  %v75_v1 = vld [vmem:[%s2745_s2 + $0x10] sm:$0xff]  ;;  %v74_v2 = vld [vmem:[%s2745_s2 + $0x8] sm:$0xff]  ;;  %v2103_v4 = vmov 0   ;;  %s2104_s1 = smov 64  }
   0x4   :  { %157 = vmatpush.msra.mxu0 %v76_v0  ;;  %v1954_v3 = vld [vmem:[%s2747_s4] ss:$0 sm:$0xff]  ;;  %1951 = vset.pattern.permute.xlu0 %v2103_v4 }
   0x5   :  { %v73_v5 = vld [vmem:[%s2745_s2] sm:$0xff]  ;;  %227 = vmatpush.msra.mxu1 %v76_v0  ;;  %1952 = vset.pattern.permute.xlu1 %v2103_v4 }
   0x6   :  { %158 = vmatpush.msra.mxu0 %v75_v1  ;;  %187 = vrot.lane.b32.xlu0 %v1954_v3, %s2104_s1 }
   0x7   :  { %228 = vmatpush.msra.mxu1 %v75_v1  ;;  %292 = vmatpush.msra.mxu2 %v76_v0 }
   0x8   :  { %159 = vmatpush.msra.mxu0 %v74_v2  ;;  %357 = vmatpush.msra.mxu3 %v76_v0 }
   0x9   :  { %22 = vsyncpa [#allocation3], 0  ;;  %229 = vmatpush.msra.mxu1 %v74_v2  ;;  %293 = vmatpush.msra.mxu2 %v75_v1  ;;  %v2105_v6 = vmov 0.0   ;;  %s2764_s20 = sld [smem:[#allocation5_spill]]  ;;  %v2230_v13 = vld [vmem:[%s2746_s3] ss:$0 sm:$0xff] }
   0xa   :  { %160 = vmatpush.msra.mxu0 %v73_v5  ;;  %358 = vmatpush.msra.mxu3 %v75_v1  ;;  %s2765_s23 = sld [smem:[#allocation6_spill]]  ;;  %s2106_s3 = smov 96   ;;  %vm141_vm4 = vcmask 261120  }
   0xb   :  { %161 = vmatmul.f32.vlgmr.msra.gmra.mxu0 %v2105_v6  ;;  %230 = vmatpush.msra.mxu1 %v73_v5  ;;  %s2107_s4 = smov [#allocation2]  }
   0xc   :  { %294 = vmatpush.msra.mxu2 %v74_v2  ;;  %359 = vmatpush.msra.mxu3 %v74_v2  ;;  %s1872_s2 = sshll.u32 %s2107_s4, 4  ;;  %s1873_s2 = int_to_ptr.vmem [resolvable:$true] %s1872_s2 }
   0xd   :  { %1953 = vset.pattern.permute.xlu2 %v2103_v4  ;;  %422 = vmatpush.msrb.mxu0 %v76_v0 }
   0xe   :  { %295 = vmatpush.msra.mxu2 %v73_v5  ;;  %360 = vmatpush.msra.mxu3 %v73_v5 }
   0xf   :  { %v57_v7 = vld [vmem:[%s2764_s20] sm:$0xf]  ;;  %423 = vmatpush.msrb.mxu0 %v75_v1  ;;  %487 = vmatpush.msrb.mxu1 %v76_v0  ;;  %v1883_v40 = vld [vmem:[%s2764_s20 + $0x4] sm:$0xf]  ;;  %v1884_v63 = vld [vmem:[%s2764_s20 + $0x8] sm:$0xf] }
  0x10   :  { %81 = vperm.xlu0 %1951, %v57_v7   ;;  %552 = vmatpush.msrb.mxu2 %v76_v0  ;;  %v2225_v11 = vld [vmem:[%s2765_s23] ss:$0 sm:$0xff] }
  0x11   :  { %424 = vmatpush.msrb.mxu0 %v74_v2  ;;  %617 = vmatpush.msrb.mxu3 %v76_v0 }
  0x12   :  { %488 = vmatpush.msrb.mxu1 %v75_v1  ;;  %553 = vmatpush.msrb.mxu2 %v75_v1 }
  0x13   :  { %425 = vmatpush.msrb.mxu0 %v73_v5  ;;  %618 = vmatpush.msrb.mxu3 %v75_v1 }
  0x14   :  { %489 = vmatpush.msrb.mxu1 %v74_v2  ;;  %554 = vmatpush.msrb.mxu2 %v74_v2 }
  0x15   :  { %619 = vmatpush.msrb.mxu3 %v74_v2 }
  0x16   :  { %490 = vmatpush.msrb.mxu1 %v73_v5  ;;  %555 = vmatpush.msrb.mxu2 %v73_v5 }
  0x17   :  { %620 = vmatpush.msrb.mxu3 %v73_v5 }
  0x78   :  { %v2218_v8 = vpop.permute.xlu0 %187 }
  0x82   :  { %v82_v12 = vpop.permute.xlu0 %81 }
  0x83   :  { %v87_v14 = vmul.f32 %v2225_v11, %v82_v12 }
  0x85   :  { %v91_v15 = vadd.f32 %v2230_v13, %v87_v14 }
  0x88   :  { %v162_v9 = vpop.f32.mrf.mxu0 }
  0x89   :  { %v190_v10 = vadd.f32 %v2218_v8, %v162_v9  ;;  %v165_v16 = vadd.f32 %v162_v9, %v91_v15 }
  0x8b   :  { %192 = vrot.lane.b32.xlu1 %v190_v10, %s2104_s1  ;;  %v1890_v17 = vmul.f32 -1.442695, %v165_v16 }
  0x8d   :  { %1963 = vpow2.f32 %v1890_v17 }
  0x93   :  { %v1964_v18 = vpop.eup %1963 }
  0x94   :  { %v169_v19 = vadd.f32 1.0, %v1964_v18 }
  0x96   :  { %1965 = vrcp.f32 %v169_v19  ;;  %v181_v25 = vand.u32 2147483648, %v169_v19  ;;  %vm175_vm1 = vweird.f32 %v169_v19  ;;  %v179_v26 = vand.u32 2147483647, %v169_v19 }
  0x98   :  { %v182_v28 = vor.u32 1.1754944e-38, %v181_v25  ;;  %vm180_vm3 = vcmp.eq.f32.partialorder %v179_v26, 8.507059e+37 }
  0x9c   :  { %v1966_v20 = vpop.eup %1965 }
  0x9d   :  { %v171_v21 = vmul.f32 %v1966_v20, %v169_v19  ;;  %vm176_vm0 = vweird.f32 %v1966_v20 }
  0x9e   :  { %vm177_vm2 = vmor %vm175_vm1, %vm176_vm0 }
  0x9f   :  { %v172_v22 = vsub.f32 1.0, %v171_v21 }
  0xa1   :  { %v173_v23 = vmul.f32 %v1966_v20, %v172_v22 }
  0xa3   :  { %v174_v24 = vadd.f32 %v1966_v20, %v173_v23 }
  0xa5   :  { %v178_v27 = vsel %vm177_vm2, %v1966_v20, %v174_v24 }
  0xa6   :  { %v183_v30 = vsel %vm180_vm3, %v182_v28, %v178_v27 }
  0xa7   :  { %v202_v35 = vsub.f32 1.0, %v183_v30  ;;  %v208_v37 = vmul.f32 0.0, %v183_v30 }
  0xfd   :  { %v193_v29 = vpop.permute.xlu1 %192 }
  0xfe   :  { %v195_v31 = vmul.f32 %v193_v29, %v183_v30 }
 0x100   :  { %197 = vrot.lane.b32.xlu1 %v195_v31, %s2104_s1 }
 0x108   :  { %94 = vperm.xlu1 %1952, %v1883_v40  }
 0x172   :  { %v198_v32 = vpop.permute.xlu1 %197 }
 0x173   :  { %v200_v33 = vadd.f32 %v198_v32, %v91_v15 }
 0x175   :  { %1967 = vtanh.f32 %v200_v33 }
 0x17a   :  { %v95_v44 = vpop.permute.xlu1 %94 }
 0x17b   :  { %v1968_v34 = vpop.eup %1967  ;;  %v97_v45 = vmul.f32 %v2225_v11, %v95_v44 }
 0x17c   :  { %204 = vrot.lane.b32.xlu2 %v1968_v34, %s2106_s3 }
 0x17d   :  { %v98_v46 = vadd.f32 %v2230_v13, %v97_v45 }
 0x1d6   :  { %v205_v36 = vpop.permute.xlu2 %204 }
 0x1d7   :  { %v207_v38 = vmul.f32 %v205_v36, %v202_v35 }
 0x1d9   :  { %v209_v39 = vadd.f32 %v208_v37, %v207_v38 }
 0x1db   :  { %211 = vrot.lane.b32.xlu2 %v209_v39, %s2106_s3 }
 0x235   :  { %v2240_v41 = vpop.permute.xlu2 %211 }
 0x236   :  { %1891 = vmatmul.msk.f32.vlgmr.msra.gmra.mxu1 %vm141_vm4, %v2240_v41 }
 0x2b3   :  { %v232_v42 = vpop.f32.mrf.mxu1 }
 0x2b4   :  { %v255_v43 = vadd.f32 %v232_v42, %v2218_v8  ;;  %v235_v47 = vadd.f32 %v232_v42, %v98_v46 }
 0x2b6   :  { %257 = vrot.lane.b32.xlu2 %v255_v43, %s2104_s1  ;;  %v1892_v48 = vmul.f32 -1.442695, %v235_v47  ;;  %v1885_v43 = vld [vmem:[%s2764_s20 + $0xc] sm:$0xf] }
 0x2b8   :  { %1969 = vpow2.f32 %v1892_v48 }
 0x2be   :  { %v1970_v49 = vpop.eup %1969 }
 0x2bf   :  { %v239_v50 = vadd.f32 1.0, %v1970_v49 }
 0x2c1   :  { %1971 = vrcp.f32 %v239_v50  ;;  %v251_v56 = vand.u32 2147483648, %v239_v50  ;;  %vm245_vm6 = vweird.f32 %v239_v50  ;;  %v249_v57 = vand.u32 2147483647, %v239_v50 }
 0x2c3   :  { %v252_v59 = vor.u32 1.1754944e-38, %v251_v56  ;;  %vm250_vm8 = vcmp.eq.f32.partialorder %v249_v57, 8.507059e+37 }
 0x2c7   :  { %v1972_v51 = vpop.eup %1971 }
 0x2c8   :  { %v241_v52 = vmul.f32 %v1972_v51, %v239_v50  ;;  %vm246_vm5 = vweird.f32 %v1972_v51 }
 0x2c9   :  { %vm247_vm7 = vmor %vm245_vm6, %vm246_vm5 }
 0x2ca   :  { %v242_v53 = vsub.f32 1.0, %v241_v52 }
 0x2cc   :  { %v243_v54 = vmul.f32 %v1972_v51, %v242_v53 }
 0x2ce   :  { %v244_v55 = vadd.f32 %v1972_v51, %v243_v54 }
 0x2d0   :  { %v248_v58 = vsel %vm247_vm7, %v1972_v51, %v244_v55 }
 0x2d1   :  { %v253_v61 = vsel %vm250_vm8, %v252_v59, %v248_v58 }
 0x2d2   :  { %v267_v3 = vsub.f32 1.0, %v253_v61  ;;  %v273_v5 = vmul.f32 %v253_v61, %v209_v39 }
 0x310   :  { %v258_v60 = vpop.permute.xlu2 %257 }
 0x311   :  { %v260_v62 = vmul.f32 %v258_v60, %v253_v61 }
 0x313   :  { %262 = vrot.lane.b32.xlu0 %v260_v62, %s2104_s1 }
 0x31b   :  { %101 = vperm.xlu0 %1951, %v1884_v63  }
 0x385   :  { %v263_v0 = vpop.permute.xlu0 %262 }
 0x386   :  { %v265_v1 = vadd.f32 %v263_v0, %v98_v46 }
 0x388   :  { %1973 = vtanh.f32 %v265_v1 }
 0x38d   :  { %v102_v15 = vpop.permute.xlu0 %101 }
 0x38e   :  { %v1974_v2 = vpop.eup %1973  ;;  %v104_v16 = vmul.f32 %v2225_v11, %v102_v15 }
 0x38f   :  { %269 = vrot.lane.b32.xlu1 %v1974_v2, %s2106_s3  ;;  %v1886_v2 = vld [vmem:[%s2764_s20 + $0x10] sm:$0xf] }
 0x390   :  { %v105_v17 = vadd.f32 %v2230_v13, %v104_v16  ;;  %v2288_v16 = vld [vmem:[%s2748_s5 + $0x18] sm:$0xff] }
 0x391   :  { %690 = vmatpush.msra.mxu0 %v2288_v16  ;;  %710 = vmatpush.msra.mxu1 %v2288_v16 }
 0x401   :  { %v270_v4 = vpop.permute.xlu1 %269 }
 0x402   :  { %v272_v7 = vmul.f32 %v270_v4, %v267_v3 }
 0x404   :  { %v274_v9 = vadd.f32 %v273_v5, %v272_v7 }
 0x406   :  { %276 = vrot.lane.b32.xlu2 %v274_v9, %s2106_s3 }
 0x460   :  { %v2254_v10 = vpop.permute.xlu2 %276 }
 0x461   :  { %1893 = vmatmul.msk.f32.vlgmr.msra.gmra.mxu2 %vm141_vm4, %v2254_v10 }
 0x462   :  { %730 = vmatpush.msra.mxu2 %v2288_v16 }
 0x4e4   :  { %v297_v12 = vpop.f32.mrf.mxu2 }
 0x4e5   :  { %v320_v14 = vadd.f32 %v297_v12, %v2218_v8  ;;  %v300_v18 = vadd.f32 %v297_v12, %v105_v17 }
 0x4e7   :  { %322 = vrot.lane.b32.xlu1 %v320_v14, %s2104_s1  ;;  %v1894_v19 = vmul.f32 -1.442695, %v300_v18  ;;  %v2300_v18 = vld [vmem:[%s2748_s5 + $0x8] sm:$0xff] }
 0x4e9   :  { %1975 = vpow2.f32 %v1894_v19  ;;  %v2309_v19 = vld [vmem:[%s2748_s5] sm:$0xff] }
 0x4ef   :  { %v1976_v20 = vpop.eup %1975 }
 0x4f0   :  { %v304_v21 = vadd.f32 1.0, %v1976_v20 }
 0x4f2   :  { %1977 = vrcp.f32 %v304_v21  ;;  %v316_v27 = vand.u32 2147483648, %v304_v21  ;;  %vm310_vm10 = vweird.f32 %v304_v21  ;;  %v314_v28 = vand.u32 2147483647, %v304_v21 }
 0x4f4   :  { %v317_v30 = vor.u32 1.1754944e-38, %v316_v27  ;;  %vm315_vm12 = vcmp.eq.f32.partialorder %v314_v28, 8.507059e+37 }
 0x4f8   :  { %v1978_v22 = vpop.eup %1977 }
 0x4f9   :  { %v306_v23 = vmul.f32 %v1978_v22, %v304_v21  ;;  %vm311_vm9 = vweird.f32 %v1978_v22 }
 0x4fa   :  { %vm312_vm11 = vmor %vm310_vm10, %vm311_vm9 }
 0x4fb   :  { %v307_v24 = vsub.f32 1.0, %v306_v23 }
 0x4fd   :  { %v308_v25 = vmul.f32 %v1978_v22, %v307_v24 }
 0x4ff   :  { %v309_v26 = vadd.f32 %v1978_v22, %v308_v25 }
 0x501   :  { %v313_v29 = vsel %vm312_vm11, %v1978_v22, %v309_v26 }
 0x502   :  { %v318_v32 = vsel %vm315_vm12, %v317_v30, %v313_v29 }
 0x503   :  { %v332_v37 = vsub.f32 1.0, %v318_v32  ;;  %v338_v39 = vmul.f32 %v318_v32, %v274_v9 }
 0x559   :  { %v323_v31 = vpop.permute.xlu1 %322 }
 0x55a   :  { %v325_v33 = vmul.f32 %v323_v31, %v318_v32 }
 0x55c   :  { %327 = vrot.lane.b32.xlu2 %v325_v33, %s2104_s1 }
 0x564   :  { %108 = vperm.xlu2 %1953, %v1885_v43  }
 0x5b6   :  { %v328_v34 = vpop.permute.xlu2 %327 }
 0x5b7   :  { %v330_v35 = vadd.f32 %v328_v34, %v105_v17  ;;  %v2293_v17 = vld [vmem:[%s2748_s5 + $0x10] sm:$0xff] }
 0x5b8   :  { %691 = vmatpush.msra.mxu0 %v2293_v17  ;;  %711 = vmatpush.msra.mxu1 %v2293_v17 }
 0x5b9   :  { %1979 = vtanh.f32 %v330_v35  ;;  %731 = vmatpush.msra.mxu2 %v2293_v17 }
 0x5ba   :  { %692 = vmatpush.msra.mxu0 %v2300_v18  ;;  %712 = vmatpush.msra.mxu1 %v2300_v18 }
 0x5bb   :  { %732 = vmatpush.msra.mxu2 %v2300_v18 }
 0x5bc   :  { %693 = vmatpush.msra.mxu0 %v2309_v19  ;;  %713 = vmatpush.msra.mxu1 %v2309_v19 }
 0x5bd   :  { %733 = vmatpush.msra.mxu2 %v2309_v19 }
 0x5be   :  { %v109_v47 = vpop.permute.xlu2 %108 }
 0x5bf   :  { %v1980_v36 = vpop.eup %1979  ;;  %v111_v48 = vmul.f32 %v2225_v11, %v109_v47 }
 0x5c0   :  { %334 = vrot.lane.b32.xlu0 %v1980_v36, %s2106_s3 }
 0x5c1   :  { %v112_v49 = vadd.f32 %v2230_v13, %v111_v48 }
 0x632   :  { %v335_v38 = vpop.permute.xlu0 %334 }
 0x633   :  { %v337_v40 = vmul.f32 %v335_v38, %v332_v37 }
 0x635   :  { %v339_v42 = vadd.f32 %v338_v39, %v337_v40 }
 0x637   :  { %341 = vrot.lane.b32.xlu1 %v339_v42, %s2106_s3 }
 0x6a9   :  { %v2268_v44 = vpop.permute.xlu1 %341 }
 0x6aa   :  { %1895 = vmatmul.msk.f32.vlgmr.msra.gmra.mxu3 %vm141_vm4, %v2268_v44 }
 0x6ab   :  { %750 = vmatpush.msra.mxu3 %v2288_v16 }
 0x6ad   :  { %751 = vmatpush.msra.mxu3 %v2293_v17 }
 0x6af   :  { %752 = vmatpush.msra.mxu3 %v2300_v18 }
 0x6b1   :  { %753 = vmatpush.msra.mxu3 %v2309_v19 }
 0x72d   :  { %v362_v45 = vpop.f32.mrf.mxu3 }
 0x72e   :  { %v385_v46 = vadd.f32 %v362_v45, %v2218_v8  ;;  %v365_v50 = vadd.f32 %v362_v45, %v112_v49 }
 0x730   :  { %387 = vrot.lane.b32.xlu0 %v385_v46, %s2104_s1  ;;  %v1896_v51 = vmul.f32 -1.442695, %v365_v50 }
 0x732   :  { %1981 = vpow2.f32 %v1896_v51 }
 0x738   :  { %v1982_v52 = vpop.eup %1981 }
 0x739   :  { %v369_v53 = vadd.f32 1.0, %v1982_v52  ;;  %v2348_v52 = vld [vmem:[%s2749_s6 + $0x18] sm:$0xff] }
 0x73b   :  { %1983 = vrcp.f32 %v369_v53  ;;  %v381_v59 = vand.u32 2147483648, %v369_v53  ;;  %vm375_vm14 = vweird.f32 %v369_v53  ;;  %v379_v60 = vand.u32 2147483647, %v369_v53 }
 0x73d   :  { %v382_v62 = vor.u32 1.1754944e-38, %v381_v59  ;;  %vm380_vm0 = vcmp.eq.f32.partialorder %v379_v60, 8.507059e+37 }
 0x741   :  { %v1984_v54 = vpop.eup %1983 }
 0x742   :  { %v371_v55 = vmul.f32 %v1984_v54, %v369_v53  ;;  %vm376_vm13 = vweird.f32 %v1984_v54  ;;  %v2353_v53 = vld [vmem:[%s2749_s6 + $0x10] sm:$0xff] }
 0x743   :  { %vm377_vm15 = vmor %vm375_vm14, %vm376_vm13 }
 0x744   :  { %v372_v56 = vsub.f32 1.0, %v371_v55  ;;  %v2365_v55 = vld [vmem:[%s2749_s6] sm:$0xff] }
 0x746   :  { %v373_v57 = vmul.f32 %v1984_v54, %v372_v56  ;;  %v1958_v56 = vld [vmem:[%s2751_s8] ss:$0 sm:$0xff] }
 0x748   :  { %v374_v58 = vadd.f32 %v1984_v54, %v373_v57 }
 0x74a   :  { %v378_v61 = vsel %vm377_vm15, %v1984_v54, %v374_v58  ;;  %v2359_v54 = vld [vmem:[%s2749_s6 + $0x8] sm:$0xff]  ;;  %s1874_s6 = sshll.u32 %s2760_s17, 4  ;;  %s1875_s6 = int_to_ptr.hbm [resolvable:$true] %s1874_s6 }
 0x74b   :  { %v383_v0 = vsel %vm380_vm0, %v382_v62, %v378_v61 }
 0x74c   :  { %v397_v7 = vsub.f32 1.0, %v383_v0  ;;  %v403_v12 = vmul.f32 %v383_v0, %v339_v42  ;;  %v1887_v42 = vld [vmem:[%s2764_s20 + $0x14] sm:$0xf] }
 0x7a2   :  { %v388_v63 = vpop.permute.xlu0 %387 }
 0x7a3   :  { %v390_v1 = vmul.f32 %v388_v63, %v383_v0 }
 0x7a5   :  { %392 = vrot.lane.b32.xlu1 %v390_v1, %s2104_s1 }
 0x7ad   :  { %115 = vperm.xlu1 %1952, %v1886_v2  }
 0x817   :  { %v393_v3 = vpop.permute.xlu1 %392 }
 0x818   :  { %v395_v4 = vadd.f32 %v393_v3, %v112_v49 }
 0x81a   :  { %1985 = vtanh.f32 %v395_v4 }
 0x81f   :  { %v116_v23 = vpop.permute.xlu1 %115 }
 0x820   :  { %v1986_v5 = vpop.eup %1985  ;;  %v118_v24 = vmul.f32 %v2225_v11, %v116_v23 }
 0x821   :  { %399 = vrot.lane.b32.xlu2 %v1986_v5, %s2106_s3 }
 0x822   :  { %v119_v25 = vadd.f32 %v2230_v13, %v118_v24 }
 0x87b   :  { %v400_v9 = vpop.permute.xlu2 %399 }
 0x87c   :  { %v402_v14 = vmul.f32 %v400_v9, %v397_v7  ;;  %v2403_v7 = vld [vmem:[%s2750_s7] ss:$0 sm:$0xff] }
 0x87e   :  { %v2281_v15 = vadd.f32 %v403_v12, %v402_v14 }
 0x880   :  { %406 = vrot.lane.b32.xlu0 %v2281_v15, %s2106_s3 }
 0x8f2   :  { %v2321_v20 = vpop.permute.xlu0 %406 }
 0x8f3   :  { %1897 = vmatmul.msk.f32.vlgmr.msrb.gmra.mxu0 %vm141_vm4, %v2321_v20 }
 0x8f4   :  { %770 = vmatpush.msrb.mxu0 %v2288_v16 }
 0x8f6   :  { %771 = vmatpush.msrb.mxu0 %v2293_v17 }
 0x8f8   :  { %772 = vmatpush.msrb.mxu0 %v2300_v18 }
 0x8fa   :  { %773 = vmatpush.msrb.mxu0 %v2309_v19 }
 0x8fb   :  { %1905 = vmatmul.msk.f32.vlgmr.msra.gmra.mxu0 %vm141_vm4, %v2240_v41 }
 0x8fc   :  { %855 = vmatpush.msra.mxu0 %v2348_v52 }
 0x8fe   :  { %856 = vmatpush.msra.mxu0 %v2353_v53 }
 0x900   :  { %857 = vmatpush.msra.mxu0 %v2359_v54 }
 0x902   :  { %858 = vmatpush.msra.mxu0 %v2365_v55 }
 0x970   :  { %v427_v21 = vpop.f32.mrf.mxu0 }
 0x971   :  { %v450_v22 = vadd.f32 %v427_v21, %v2218_v8  ;;  %v430_v26 = vadd.f32 %v427_v21, %v119_v25 }
 0x973   :  { %452 = vrot.lane.b32.xlu2 %v450_v22, %s2104_s1  ;;  %v1898_v27 = vmul.f32 -1.442695, %v430_v26 }
 0x975   :  { %1987 = vpow2.f32 %v1898_v27 }
 0x978   :  { %v695_v58 = vpop.f32.mrf.mxu0 }
 0x979   :  { %v696_v12 = vadd.f32 %v2403_v7, %v695_v58  ;;  %v1888_v58 = vld [vmem:[%s2764_s20 + $0x18] sm:$0xf] }
 0x97b   :  { %v1988_v28 = vpop.eup %1987 }
 0x97c   :  { %v434_v29 = vadd.f32 1.0, %v1988_v28 }
 0x97e   :  { %1989 = vrcp.f32 %v434_v29  ;;  %v446_v34 = vand.u32 2147483648, %v434_v29  ;;  %vm440_vm2 = vweird.f32 %v434_v29  ;;  %v444_v35 = vand.u32 2147483647, %v434_v29 }
 0x980   :  { %v447_v37 = vor.u32 1.1754944e-38, %v446_v34  ;;  %vm445_vm5 = vcmp.eq.f32.partialorder %v444_v35, 8.507059e+37 }
 0x984   :  { %v1990_v30 = vpop.eup %1989 }
 0x985   :  { %v436_v31 = vmul.f32 %v1990_v30, %v434_v29  ;;  %vm441_vm1 = vweird.f32 %v1990_v30 }
 0x986   :  { %vm442_vm3 = vmor %vm440_vm2, %vm441_vm1 }
 0x987   :  { %v437_v32 = vsub.f32 1.0, %v436_v31 }
 0x989   :  { %v438_v41 = vmul.f32 %v1990_v30, %v437_v32 }
 0x98b   :  { %v439_v33 = vadd.f32 %v1990_v30, %v438_v41 }
 0x98d   :  { %v443_v36 = vsel %vm442_vm3, %v1990_v30, %v439_v33 }
 0x98e   :  { %v448_v39 = vsel %vm445_vm5, %v447_v37, %v443_v36 }
 0x98f   :  { %v462_v47 = vsub.f32 1.0, %v448_v39  ;;  %v468_v49 = vmul.f32 %v448_v39, %v2281_v15 }
 0x9cd   :  { %v453_v38 = vpop.permute.xlu2 %452 }
 0x9ce   :  { %v455_v40 = vmul.f32 %v453_v38, %v448_v39 }
 0x9d0   :  { %457 = vrot.lane.b32.xlu0 %v455_v40, %s2104_s1 }
 0x9d8   :  { %122 = vperm.xlu0 %1951, %v1887_v42  }
 0xa42   :  { %v458_v43 = vpop.permute.xlu0 %457 }
 0xa43   :  { %v460_v45 = vadd.f32 %v458_v43, %v119_v25 }
 0xa45   :  { %1991 = vtanh.f32 %v460_v45 }
 0xa4a   :  { %v123_v63 = vpop.permute.xlu0 %122 }
 0xa4b   :  { %v1992_v46 = vpop.eup %1991  ;;  %v125_v0 = vmul.f32 %v2225_v11, %v123_v63 }
 0xa4c   :  { %464 = vrot.lane.b32.xlu1 %v1992_v46, %s2106_s3 }
 0xa4d   :  { %v126_v1 = vadd.f32 %v2230_v13, %v125_v0 }
 0xa54   :  { %885 = vrot.lane.b32.xlu1 %v1958_v56, %s2104_s1 }
 0xabe   :  { %v465_v48 = vpop.permute.xlu1 %464 }
 0xabf   :  { %v467_v50 = vmul.f32 %v465_v48, %v462_v47 }
 0xac1   :  { %v2341_v51 = vadd.f32 %v468_v49, %v467_v50 }
 0xac3   :  { %471 = vrot.lane.b32.xlu2 %v2341_v51, %s2106_s3 }
 0xac6   :  { %v2394_v62 = vpop.permute.xlu1 %885 }
 0xb1d   :  { %v472_v57 = vpop.permute.xlu2 %471 }
 0xb1e   :  { %1899 = vmatmul.msk.f32.vlgmr.msrb.gmra.mxu1 %vm141_vm4, %v472_v57  ;;  %1909 = vmatmul.msk.f32.vlgmr.msrb.gmra.mxu0 %vm141_vm4, %v472_v57 }
 0xb1f   :  { %790 = vmatpush.msrb.mxu1 %v2288_v16  ;;  %1120 = vmatpush.msrb.mxu0 %v2348_v52 }
 0xb21   :  { %791 = vmatpush.msrb.mxu1 %v2293_v17  ;;  %1121 = vmatpush.msrb.mxu0 %v2353_v53 }
 0xb23   :  { %792 = vmatpush.msrb.mxu1 %v2300_v18  ;;  %1122 = vmatpush.msrb.mxu0 %v2359_v54 }
 0xb25   :  { %793 = vmatpush.msrb.mxu1 %v2309_v19  ;;  %1123 = vmatpush.msrb.mxu0 %v2365_v55 }
 0xb26   :  { %1906 = vmatmul.msk.f32.vlgmr.msra.gmra.mxu1 %vm141_vm4, %v2254_v10  ;;  %859 = vmatmul.f32.vlgmr.msra.gmra.mxu0 %v2105_v6 }
 0xb27   :  { %925 = vmatpush.msra.mxu1 %v2348_v52 }
 0xb29   :  { %926 = vmatpush.msra.mxu1 %v2353_v53 }
 0xb2b   :  { %927 = vmatpush.msra.mxu1 %v2359_v54 }
 0xb2d   :  { %928 = vmatpush.msra.mxu1 %v2365_v55 }
 0xb9b   :  { %v492_v59 = vpop.f32.mrf.mxu1  ;;  %v2390_v60 = vpop.f32.mrf.mxu0 }
 0xb9c   :  { %v515_v61 = vadd.f32 %v492_v59, %v2218_v8  ;;  %v495_v2 = vadd.f32 %v492_v59, %v126_v1 }
 0xb9e   :  { %517 = vrot.lane.b32.xlu2 %v515_v61, %s2104_s1  ;;  %v1900_v3 = vmul.f32 -1.442695, %v495_v2 }
 0xba0   :  { %1993 = vpow2.f32 %v1900_v3 }
 0xba3   :  { %v860_v10 = vpop.f32.mrf.mxu0 }
 0xba4   :  { %v888_v6 = vadd.f32 %v2394_v62, %v860_v10  ;;  %v863_v15 = vadd.f32 %v860_v10, %v696_v12 }
 0xba6   :  { %890 = vrot.lane.b32.xlu0 %v888_v6, %s2104_s1  ;;  %v1994_v4 = vpop.eup %1993  ;;  %v1913_v22 = vmul.f32 -1.442695, %v863_v15 }
 0xba7   :  { %v499_v5 = vadd.f32 1.0, %v1994_v4 }
 0xba9   :  { %1995 = vrcp.f32 %v499_v5  ;;  %v511_v25 = vand.u32 2147483648, %v499_v5  ;;  %vm505_vm7 = vweird.f32 %v499_v5  ;;  %v509_v26 = vand.u32 2147483647, %v499_v5 }
 0xbaa   :  { %1997 = vpow2.f32 %v1913_v22 }
 0xbab   :  { %v512_v29 = vor.u32 1.1754944e-38, %v511_v25  ;;  %vm510_vm9 = vcmp.eq.f32.partialorder %v509_v26, 8.507059e+37 }
 0xbaf   :  { %v1996_v9 = vpop.eup %1995 }
 0xbb0   :  { %v501_v14 = vmul.f32 %v1996_v9, %v499_v5  ;;  %vm506_vm6 = vweird.f32 %v1996_v9  ;;  %v1998_v27 = vpop.eup %1997 }
 0xbb1   :  { %vm507_vm8 = vmor %vm505_vm7, %vm506_vm6  ;;  %v867_v30 = vadd.f32 1.0, %v1998_v27 }
 0xbb2   :  { %v502_v21 = vsub.f32 1.0, %v501_v14  ;;  %v715_v14 = vpop.f32.mrf.mxu1 }
 0xbb3   :  { %1999 = vrcp.f32 %v867_v30  ;;  %v879_v38 = vand.u32 2147483648, %v867_v30  ;;  %vm873_vm11 = vweird.f32 %v867_v30  ;;  %v877_v39 = vand.u32 2147483647, %v867_v30 }
 0xbb4   :  { %v503_v23 = vmul.f32 %v1996_v9, %v502_v21 }
 0xbb5   :  { %v880_v42 = vor.u32 1.1754944e-38, %v879_v38  ;;  %vm878_vm13 = vcmp.eq.f32.partialorder %v877_v39, 8.507059e+37 }
 0xbb6   :  { %v504_v24 = vadd.f32 %v1996_v9, %v503_v23 }
 0xbb8   :  { %v508_v28 = vsel %vm507_vm8, %v1996_v9, %v504_v24 }
 0xbb9   :  { %v513_v32 = vsel %vm510_vm9, %v512_v29, %v508_v28  ;;  %v2000_v33 = vpop.eup %1999 }
 0xbba   :  { %v869_v34 = vmul.f32 %v2000_v33, %v867_v30  ;;  %vm874_vm10 = vweird.f32 %v2000_v33  ;;  %v527_v59 = vsub.f32 1.0, %v513_v32  ;;  %v533_v10 = vmul.f32 %v513_v32, %v2341_v51 }
 0xbbb   :  { %vm875_vm12 = vmor %vm873_vm11, %vm874_vm10 }
 0xbbc   :  { %v870_v35 = vsub.f32 1.0, %v869_v34 }
 0xbbe   :  { %v871_v36 = vmul.f32 %v2000_v33, %v870_v35 }
 0xbc0   :  { %v872_v37 = vadd.f32 %v2000_v33, %v871_v36 }
 0xbc2   :  { %v876_v40 = vsel %vm875_vm12, %v2000_v33, %v872_v37  ;;  %v716_v37 = vadd.f32 %v2403_v7, %v715_v14  ;;  %v1889_v14 = vld [vmem:[%s2764_s20 + $0x1c] sm:$0xf] }
 0xbc3   :  { %v881_v43 = vsel %vm878_vm13, %v880_v42, %v876_v40 }
 0xbc4   :  { %v900_v0 = vsub.f32 1.0, %v881_v43  ;;  %v906_v2 = vmul.f32 0.0, %v881_v43 }
 0xbf8   :  { %v518_v31 = vpop.permute.xlu2 %517 }
 0xbf9   :  { %v520_v41 = vmul.f32 %v518_v31, %v513_v32 }
 0xbfb   :  { %522 = vrot.lane.b32.xlu1 %v520_v41, %s2104_s1 }
 0xc18   :  { %v891_v45 = vpop.permute.xlu0 %890 }
 0xc19   :  { %v893_v46 = vmul.f32 %v891_v45, %v881_v43 }
 0xc1b   :  { %895 = vrot.lane.b32.xlu2 %v893_v46, %s2104_s1 }
 0xc6d   :  { %v523_v47 = vpop.permute.xlu1 %522 }
 0xc6e   :  { %v525_v48 = vadd.f32 %v523_v47, %v126_v1 }
 0xc70   :  { %2001 = vtanh.f32 %v525_v48 }
 0xc75   :  { %v896_v49 = vpop.permute.xlu2 %895 }
 0xc76   :  { %v2002_v50 = vpop.eup %2001  ;;  %v898_v56 = vadd.f32 %v896_v49, %v696_v12 }
 0xc77   :  { %529 = vrot.lane.b32.xlu0 %v2002_v50, %s2106_s3 }
 0xc78   :  { %2003 = vtanh.f32 %v898_v56 }
 0xc7e   :  { %v2004_v57 = vpop.eup %2003 }
 0xc7f   :  { %902 = vrot.lane.b32.xlu1 %v2004_v57, %s2106_s3 }
 0xc87   :  { %129 = vperm.xlu1 %1952, %v1888_v58  }
 0xce9   :  { %v530_v61 = vpop.permute.xlu0 %529 }
 0xcea   :  { %v532_v6 = vmul.f32 %v530_v61, %v527_v59 }
 0xcec   :  { %v2414_v63 = vadd.f32 %v533_v10, %v532_v6 }
 0xcee   :  { %536 = vrot.lane.b32.xlu2 %v2414_v63, %s2106_s3 }
 0xcf1   :  { %v903_v1 = vpop.permute.xlu1 %902 }
 0xcf2   :  { %v905_v3 = vmul.f32 %v903_v1, %v900_v0 }
 0xcf4   :  { %v2418_v4 = vadd.f32 %v906_v2, %v905_v3 }
 0xcf6   :  { %909 = vrot.lane.b32.xlu0 %v2418_v4, %s2106_s3 }
 0xcf9   :  { %v130_v22 = vpop.permute.xlu1 %129 }
 0xcfa   :  { %v132_v23 = vmul.f32 %v2225_v11, %v130_v22 }
 0xcfc   :  { %v133_v24 = vadd.f32 %v2230_v13, %v132_v23 }
 0xd48   :  { %v537_v5 = vpop.permute.xlu2 %536 }
 0xd49   :  { %1901 = vmatmul.msk.f32.vlgmr.msrb.gmra.mxu2 %vm141_vm4, %v537_v5  ;;  %1910 = vmatmul.msk.f32.vlgmr.msrb.gmra.mxu1 %vm141_vm4, %v537_v5 }
 0xd4a   :  { %810 = vmatpush.msrb.mxu2 %v2288_v16  ;;  %1185 = vmatpush.msrb.mxu1 %v2348_v52 }
 0xd4c   :  { %811 = vmatpush.msrb.mxu2 %v2293_v17  ;;  %1186 = vmatpush.msrb.mxu1 %v2353_v53 }
 0xd4e   :  { %812 = vmatpush.msrb.mxu2 %v2300_v18  ;;  %1187 = vmatpush.msrb.mxu1 %v2359_v54 }
 0xd50   :  { %813 = vmatpush.msrb.mxu2 %v2309_v19  ;;  %1188 = vmatpush.msrb.mxu1 %v2365_v55 }
 0xd51   :  { %1907 = vmatmul.msk.f32.vlgmr.msra.gmra.mxu2 %vm141_vm4, %v2268_v44 }
 0xd52   :  { %990 = vmatpush.msra.mxu2 %v2348_v52 }
 0xd54   :  { %991 = vmatpush.msra.mxu2 %v2353_v53 }
 0xd56   :  { %992 = vmatpush.msra.mxu2 %v2359_v54 }
 0xd58   :  { %993 = vmatpush.msra.mxu2 %v2365_v55 }
 0xd68   :  { %v2438_v51 = vpop.permute.xlu0 %909 }
 0xd69   :  { %1914 = vmatmul.msk.f32.vlgmr.msra.gmra.mxu1 %vm141_vm4, %v2438_v51 }
 0xdc6   :  { %v2444_v44 = vpop.f32.mrf.mxu1 }
 0xdcc   :  { %v557_v9 = vpop.f32.mrf.mxu2 }
 0xdcd   :  { %v580_v12 = vadd.f32 %v557_v9, %v2218_v8  ;;  %v560_v25 = vadd.f32 %v557_v9, %v133_v24 }
 0xdcf   :  { %582 = vrot.lane.b32.xlu2 %v580_v12, %s2104_s1  ;;  %v1902_v26 = vmul.f32 -1.442695, %v560_v25 }
 0xdd1   :  { %2005 = vpow2.f32 %v1902_v26 }
 0xdd7   :  { %v2006_v27 = vpop.eup %2005 }
 0xdd8   :  { %v564_v28 = vadd.f32 1.0, %v2006_v27 }
 0xdda   :  { %2007 = vrcp.f32 %v564_v28  ;;  %v576_v33 = vand.u32 2147483648, %v564_v28  ;;  %vm570_vm15 = vweird.f32 %v564_v28  ;;  %v574_v34 = vand.u32 2147483647, %v564_v28 }
 0xddc   :  { %v577_v36 = vor.u32 1.1754944e-38, %v576_v33  ;;  %vm575_vm1 = vcmp.eq.f32.partialorder %v574_v34, 8.507059e+37 }
 0xde0   :  { %v2008_v29 = vpop.eup %2007 }
 0xde1   :  { %v566_v30 = vmul.f32 %v2008_v29, %v564_v28  ;;  %vm571_vm14 = vweird.f32 %v2008_v29 }
 0xde2   :  { %vm572_vm0 = vmor %vm570_vm15, %vm571_vm14 }
 0xde3   :  { %v567_v31 = vsub.f32 1.0, %v566_v30 }
 0xde5   :  { %v568_v32 = vmul.f32 %v2008_v29, %v567_v31 }
 0xde6   :  { %v930_v15 = vpop.f32.mrf.mxu1 }
 0xde7   :  { %v953_v21 = vadd.f32 %v930_v15, %v2394_v62  ;;  %v569_v41 = vadd.f32 %v2008_v29, %v568_v32  ;;  %v933_v40 = vadd.f32 %v930_v15, %v716_v37 }
 0xde9   :  { %955 = vrot.lane.b32.xlu0 %v953_v21, %s2104_s1  ;;  %v573_v35 = vsel %vm572_vm0, %v2008_v29, %v569_v41  ;;  %v1915_v43 = vmul.f32 -1.442695, %v933_v40 }
 0xdea   :  { %v578_v39 = vsel %vm575_vm1, %v577_v36, %v573_v35 }
 0xdeb   :  { %2009 = vpow2.f32 %v1915_v43  ;;  %v592_v15 = vsub.f32 1.0, %v578_v39  ;;  %v598_v22 = vmul.f32 %v578_v39, %v2414_v63 }
 0xdf1   :  { %v2010_v45 = vpop.eup %2009 }
 0xdf2   :  { %v937_v46 = vadd.f32 1.0, %v2010_v45 }
 0xdf4   :  { %2011 = vrcp.f32 %v937_v46  ;;  %v949_v57 = vand.u32 2147483648, %v937_v46  ;;  %vm943_vm3 = vweird.f32 %v937_v46  ;;  %v947_v58 = vand.u32 2147483647, %v937_v46 }
 0xdf6   :  { %v950_v61 = vor.u32 1.1754944e-38, %v949_v57  ;;  %vm948_vm6 = vcmp.eq.f32.partialorder %v947_v58, 8.507059e+37 }
 0xdfa   :  { %v2012_v47 = vpop.eup %2011 }
 0xdfb   :  { %v939_v48 = vmul.f32 %v2012_v47, %v937_v46  ;;  %vm944_vm2 = vweird.f32 %v2012_v47 }
 0xdfc   :  { %vm945_vm5 = vmor %vm943_vm3, %vm944_vm2 }
 0xdfd   :  { %v940_v49 = vsub.f32 1.0, %v939_v48 }
 0xdff   :  { %v941_v50 = vmul.f32 %v2012_v47, %v940_v49 }
 0xe01   :  { %v942_v56 = vadd.f32 %v2012_v47, %v941_v50 }
 0xe03   :  { %v946_v59 = vsel %vm945_vm5, %v2012_v47, %v942_v56 }
 0xe04   :  { %v951_v6 = vsel %vm948_vm6, %v950_v61, %v946_v59 }
 0xe05   :  { %v965_v25 = vsub.f32 1.0, %v951_v6  ;;  %v971_v27 = vmul.f32 %v951_v6, %v2418_v4 }
 0xe29   :  { %v583_v38 = vpop.permute.xlu2 %582 }
 0xe2a   :  { %v585_v42 = vmul.f32 %v583_v38, %v578_v39 }
 0xe2c   :  { %587 = vrot.lane.b32.xlu1 %v585_v42, %s2104_s1 }
 0xe5b   :  { %v956_v10 = vpop.permute.xlu0 %955 }
 0xe5c   :  { %v958_v0 = vmul.f32 %v956_v10, %v951_v6 }
 0xe5e   :  { %960 = vrot.lane.b32.xlu2 %v958_v0, %s2104_s1 }
 0xe9e   :  { %v588_v1 = vpop.permute.xlu1 %587 }
 0xe9f   :  { %v590_v2 = vadd.f32 %v588_v1, %v133_v24 }
 0xea1   :  { %2013 = vtanh.f32 %v590_v2 }
 0xea7   :  { %v2014_v3 = vpop.eup %2013 }
 0xea8   :  { %594 = vrot.lane.b32.xlu0 %v2014_v3, %s2106_s3 }
 0xeb8   :  { %v961_v5 = vpop.permute.xlu2 %960 }
 0xeb9   :  { %v963_v9 = vadd.f32 %v961_v5, %v716_v37 }
 0xebb   :  { %2015 = vtanh.f32 %v963_v9 }
 0xec1   :  { %v2016_v12 = vpop.eup %2015 }
 0xec2   :  { %967 = vrot.lane.b32.xlu1 %v2016_v12, %s2106_s3 }
 0xeca   :  { %136 = vperm.xlu1 %1952, %v1889_v14  }
 0xf1a   :  { %v595_v21 = vpop.permute.xlu0 %594 }
 0xf1b   :  { %v597_v23 = vmul.f32 %v595_v21, %v592_v15 }
 0xf1d   :  { %v2459_v24 = vadd.f32 %v598_v22, %v597_v23 }
 0xf1f   :  { %601 = vrot.lane.b32.xlu2 %v2459_v24, %s2106_s3 }
 0xf34   :  { %v968_v26 = vpop.permute.xlu1 %967 }
 0xf35   :  { %v970_v28 = vmul.f32 %v968_v26, %v965_v25 }
 0xf37   :  { %v2464_v29 = vadd.f32 %v971_v27, %v970_v28 }
 0xf39   :  { %974 = vrot.lane.b32.xlu0 %v2464_v29, %s2106_s3 }
 0xf79   :  { %v602_v30 = vpop.permute.xlu2 %601 }
 0xf7a   :  { %1903 = vmatmul.msk.f32.vlgmr.msrb.gmra.mxu3 %vm141_vm4, %v602_v30  ;;  %1911 = vmatmul.msk.f32.vlgmr.msrb.gmra.mxu2 %vm141_vm4, %v602_v30 }
 0xf7b   :  { %835 = vmatpush.msrb.mxu3 %v2288_v16  ;;  %1250 = vmatpush.msrb.mxu2 %v2348_v52 }
 0xf7d   :  { %836 = vmatpush.msrb.mxu3 %v2293_v17  ;;  %1251 = vmatpush.msrb.mxu2 %v2353_v53 }
 0xf7f   :  { %837 = vmatpush.msrb.mxu3 %v2300_v18  ;;  %1252 = vmatpush.msrb.mxu2 %v2359_v54 }
 0xf81   :  { %838 = vmatpush.msrb.mxu3 %v2309_v19  ;;  %1253 = vmatpush.msrb.mxu2 %v2365_v55  ;;  %v735_v19 = vpop.f32.mrf.mxu2 }
 0xf82   :  { %1908 = vmatmul.msk.f32.vlgmr.msra.gmra.mxu3 %vm141_vm4, %v2321_v20  ;;  %v137_v20 = vpop.permute.xlu1 %136  ;;  %v736_v48 = vadd.f32 %v2403_v7, %v735_v19 }
 0xf83   :  { %1055 = vmatpush.msra.mxu3 %v2348_v52  ;;  %v139_v63 = vmul.f32 %v2225_v11, %v137_v20 }
 0xf85   :  { %1056 = vmatpush.msra.mxu3 %v2353_v53  ;;  %v140_v4 = vadd.f32 %v2230_v13, %v139_v63 }
 0xf87   :  { %1057 = vmatpush.msra.mxu3 %v2359_v54 }
 0xf89   :  { %1058 = vmatpush.msra.mxu3 %v2365_v55 }
 0xfab   :  { %v2484_v16 = vpop.permute.xlu0 %974 }
 0xfac   :  { %1916 = vmatmul.msk.f32.vlgmr.msra.gmra.mxu2 %vm141_vm4, %v2484_v16 }
 0xffd   :  { %v622_v17 = vpop.f32.mrf.mxu3  ;;  %v2492_v31 = vpop.f32.mrf.mxu2 }
 0xffe   :  { %v645_v18 = vadd.f32 %v622_v17, %v2218_v8  ;;  %v625_v32 = vadd.f32 %v622_v17, %v140_v4 }
0x1000   :  { %647 = vrot.lane.b32.xlu2 %v645_v18, %s2104_s1  ;;  %v1904_v41 = vmul.f32 -1.442695, %v625_v32 }
0x1002   :  { %2017 = vpow2.f32 %v1904_v41 }
0x1008   :  { %v2018_v35 = vpop.eup %2017 }
0x1009   :  { %v629_v8 = vadd.f32 1.0, %v2018_v35 }
0x100b   :  { %2019 = vrcp.f32 %v629_v8  ;;  %v641_v13 = vand.u32 2147483648, %v629_v8  ;;  %vm635_vm8 = vweird.f32 %v629_v8  ;;  %v639_v40 = vand.u32 2147483647, %v629_v8 }
0x100d   :  { %v642_v43 = vor.u32 1.1754944e-38, %v641_v13  ;;  %vm640_vm10 = vcmp.eq.f32.partialorder %v639_v40, 8.507059e+37 }
0x1011   :  { %v2020_v36 = vpop.eup %2019 }
0x1012   :  { %v631_v37 = vmul.f32 %v2020_v36, %v629_v8  ;;  %vm636_vm7 = vweird.f32 %v2020_v36 }
0x1013   :  { %vm637_vm9 = vmor %vm635_vm8, %vm636_vm7 }
0x1014   :  { %v632_v38 = vsub.f32 1.0, %v631_v37 }
0x1016   :  { %v633_v39 = vmul.f32 %v2020_v36, %v632_v38 }
0x1018   :  { %v634_v11 = vadd.f32 %v2020_v36, %v633_v39 }
0x101a   :  { %v638_v42 = vsel %vm637_vm9, %v2020_v36, %v634_v11 }
0x101b   :  { %v643_v46 = vsel %vm640_vm10, %v642_v43, %v638_v42 }
0x101c   :  { %v657_v26 = vsub.f32 1.0, %v643_v46  ;;  %v663_v28 = vmul.f32 %v643_v46, %v2459_v24 }
0x102f   :  { %v995_v33 = vpop.f32.mrf.mxu2 }
0x1030   :  { %v1018_v34 = vadd.f32 %v995_v33, %v2394_v62  ;;  %v998_v49 = vadd.f32 %v995_v33, %v736_v48 }
0x1032   :  { %1020 = vrot.lane.b32.xlu0 %v1018_v34, %s2104_s1  ;;  %v1917_v50 = vmul.f32 -1.442695, %v998_v49 }
0x1034   :  { %2021 = vpow2.f32 %v1917_v50 }
0x103a   :  { %v2022_v56 = vpop.eup %2021 }
0x103b   :  { %v1002_v57 = vadd.f32 1.0, %v2022_v56 }
0x103d   :  { %2023 = vrcp.f32 %v1002_v57  ;;  %v1014_v0 = vand.u32 2147483648, %v1002_v57  ;;  %vm1008_vm12 = vweird.f32 %v1002_v57  ;;  %v1012_v1 = vand.u32 2147483647, %v1002_v57 }
0x103f   :  { %v1015_v3 = vor.u32 1.1754944e-38, %v1014_v0  ;;  %vm1013_vm14 = vcmp.eq.f32.partialorder %v1012_v1, 8.507059e+37  ;;  %v776_v0 = vadd.f32 %v2403_v7, %v2390_v60 }
0x1043   :  { %v2024_v58 = vpop.eup %2023 }
0x1044   :  { %v1004_v59 = vmul.f32 %v2024_v58, %v1002_v57  ;;  %vm1009_vm11 = vweird.f32 %v2024_v58 }
0x1045   :  { %vm1010_vm13 = vmor %vm1008_vm12, %vm1009_vm11 }
0x1046   :  { %v1005_v61 = vsub.f32 1.0, %v1004_v59 }
0x1048   :  { %v1006_v10 = vmul.f32 %v2024_v58, %v1005_v61 }
0x104a   :  { %v1007_v6 = vadd.f32 %v2024_v58, %v1006_v10 }
0x104c   :  { %v1011_v2 = vsel %vm1010_vm13, %v2024_v58, %v1007_v6 }
0x104d   :  { %v1016_v9 = vsel %vm1013_vm14, %v1015_v3, %v1011_v2 }
0x104e   :  { %v1030_v18 = vsub.f32 1.0, %v1016_v9  ;;  %v1036_v20 = vmul.f32 %v1016_v9, %v2464_v29  ;;  %v755_v29 = vpop.f32.mrf.mxu3 }
0x105a   :  { %v648_v45 = vpop.permute.xlu2 %647 }
0x105b   :  { %v650_v47 = vmul.f32 %v648_v45, %v643_v46 }
0x105d   :  { %652 = vrot.lane.b32.xlu1 %v650_v47, %s2104_s1 }
0x10a4   :  { %v1021_v5 = vpop.permute.xlu0 %1020 }
0x10a5   :  { %v1023_v12 = vmul.f32 %v1021_v5, %v1016_v9 }
0x10a7   :  { %1025 = vrot.lane.b32.xlu2 %v1023_v12, %s2104_s1 }
0x10cf   :  { %v653_v14 = vpop.permute.xlu1 %652 }
0x10d0   :  { %v655_v15 = vadd.f32 %v653_v14, %v140_v4 }
0x10d2   :  { %2025 = vtanh.f32 %v655_v15 }
0x10d8   :  { %v2026_v21 = vpop.eup %2025 }
0x10d9   :  { %659 = vrot.lane.b32.xlu0 %v2026_v21, %s2106_s3 }
0x1101   :  { %v1026_v22 = vpop.permute.xlu2 %1025 }
0x1102   :  { %v1028_v23 = vadd.f32 %v1026_v22, %v736_v48 }
0x1104   :  { %2027 = vtanh.f32 %v1028_v23 }
0x110a   :  { %v2028_v25 = vpop.eup %2027 }
0x110b   :  { %1032 = vrot.lane.b32.xlu1 %v2028_v25, %s2106_s3 }
0x114b   :  { %v660_v27 = vpop.permute.xlu0 %659 }
0x114c   :  { %v662_v30 = vmul.f32 %v660_v27, %v657_v26 }
0x114e   :  { %v664_v17 = vadd.f32 %v663_v28, %v662_v30 }
0x1150   :  { %819 = vrot.lane.b32.xlu2 %v664_v17, %s2106_s3 }
0x117d   :  { %v1033_v19 = vpop.permute.xlu1 %1032 }
0x117e   :  { %v1035_v63 = vmul.f32 %v1033_v19, %v1030_v18 }
0x1180   :  { %v1037_v4 = vadd.f32 %v1036_v20, %v1035_v63 }
0x1182   :  { %1039 = vrot.lane.b32.xlu0 %v1037_v4, %s2106_s3 }
0x11aa   :  { %v820_v32 = vpop.permute.xlu2 %819 }
0x11ab   :  { %1912 = vmatmul.msk.f32.vlgmr.msrb.gmra.mxu3 %vm141_vm4, %v820_v32 }
0x11ac   :  { %1315 = vmatpush.msrb.mxu3 %v2348_v52  ;;  %v756_v52 = vadd.f32 %v2403_v7, %v755_v29  ;;  %v2539_v29 = vld [vmem:[%s2754_s11 + $0x18] sm:$0xff] }
0x11ad   :  { %1426 = vmatpush.msra.mxu1 %v2539_v29  ;;  %1446 = vmatpush.msra.mxu2 %v2539_v29 }
0x11ae   :  { %1316 = vmatpush.msrb.mxu3 %v2353_v53 }
0x11b0   :  { %1317 = vmatpush.msrb.mxu3 %v2359_v54 }
0x11b2   :  { %1318 = vmatpush.msrb.mxu3 %v2365_v55 }
0x11f4   :  { %v2510_v24 = vpop.permute.xlu0 %1039 }
0x11f5   :  { %1918 = vmatmul.msk.f32.vlgmr.msra.gmra.mxu3 %vm141_vm4, %v2510_v24 }
0x11f6   :  { %1466 = vmatpush.msra.mxu3 %v2539_v29 }
0x122e   :  { %v2514_v41 = vpop.f32.mrf.mxu3 }
0x1278   :  { %v1060_v33 = vpop.f32.mrf.mxu3 }
0x1279   :  { %v1083_v34 = vadd.f32 %v1060_v33, %v2394_v62  ;;  %v1063_v53 = vadd.f32 %v1060_v33, %v756_v52  ;;  %v2544_v33 = vld [vmem:[%s2754_s11 + $0x10] sm:$0xff] }
0x127a   :  { %1427 = vmatpush.msra.mxu1 %v2544_v33  ;;  %1447 = vmatpush.msra.mxu2 %v2544_v33 }
0x127b   :  { %1085 = vrot.lane.b32.xlu1 %v1083_v34, %s2104_s1  ;;  %v1919_v35 = vmul.f32 -1.442695, %v1063_v53  ;;  %v2551_v34 = vld [vmem:[%s2754_s11 + $0x8] sm:$0xff]  ;;  %1467 = vmatpush.msra.mxu3 %v2544_v33 }
0x127c   :  { %1428 = vmatpush.msra.mxu1 %v2551_v34  ;;  %1448 = vmatpush.msra.mxu2 %v2551_v34 }
0x127d   :  { %2029 = vpow2.f32 %v1919_v35  ;;  %1468 = vmatpush.msra.mxu3 %v2551_v34  ;;  %v2575_v35 = vld [vmem:[%s2756_s13 + $0x18] sm:$0xff] }
0x1283   :  { %v2030_v54 = vpop.eup %2029 }
0x1284   :  { %v1067_v55 = vadd.f32 1.0, %v2030_v54  ;;  %v2583_v54 = vld [vmem:[%s2756_s13 + $0x10] sm:$0xff] }
0x1286   :  { %2031 = vrcp.f32 %v1067_v55  ;;  %v1079_v11 = vand.u32 2147483648, %v1067_v55  ;;  %vm1073_vm0 = vweird.f32 %v1067_v55  ;;  %v1077_v13 = vand.u32 2147483647, %v1067_v55 }
0x1288   :  { %v1080_v42 = vor.u32 1.1754944e-38, %v1079_v11  ;;  %vm1078_vm2 = vcmp.eq.f32.partialorder %v1077_v13, 8.507059e+37 }
0x128c   :  { %v2032_v8 = vpop.eup %2031 }
0x128d   :  { %v1069_v36 = vmul.f32 %v2032_v8, %v1067_v55  ;;  %vm1074_vm15 = vweird.f32 %v2032_v8  ;;  %v2589_v55 = vld [vmem:[%s2756_s13 + $0x8] sm:$0xff] }
0x128e   :  { %vm1075_vm1 = vmor %vm1073_vm0, %vm1074_vm15 }
0x128f   :  { %v1070_v37 = vsub.f32 1.0, %v1069_v36 }
0x1291   :  { %v1071_v38 = vmul.f32 %v2032_v8, %v1070_v37 }
0x1293   :  { %v1072_v39 = vadd.f32 %v2032_v8, %v1071_v38  ;;  %v796_v38 = vadd.f32 %v2403_v7, %v2444_v44 }
0x1295   :  { %v1076_v40 = vsel %vm1075_vm1, %v2032_v8, %v1072_v39  ;;  %v2595_v8 = vld [vmem:[%s2756_s13] sm:$0xff] }
0x1296   :  { %v1081_v45 = vsel %vm1078_vm2, %v1080_v42, %v1076_v40 }
0x1297   :  { %v1095_v50 = vsub.f32 1.0, %v1081_v45  ;;  %v1101_v57 = vmul.f32 %v1081_v45, %v1037_v4 }
0x12ed   :  { %v1086_v43 = vpop.permute.xlu1 %1085 }
0x12ee   :  { %v1088_v46 = vmul.f32 %v1086_v43, %v1081_v45 }
0x12f0   :  { %1090 = vrot.lane.b32.xlu2 %v1088_v46, %s2104_s1 }
0x134a   :  { %v1091_v47 = vpop.permute.xlu2 %1090 }
0x134b   :  { %v1093_v48 = vadd.f32 %v1091_v47, %v756_v52  ;;  %v2559_v52 = vld [vmem:[%s2754_s11] sm:$0xff] }
0x134c   :  { %1429 = vmatpush.msra.mxu1 %v2559_v52  ;;  %1449 = vmatpush.msra.mxu2 %v2559_v52 }
0x134d   :  { %2033 = vtanh.f32 %v1093_v48  ;;  %1469 = vmatpush.msra.mxu3 %v2559_v52 }
0x1353   :  { %v2034_v49 = vpop.eup %2033 }
0x1354   :  { %1097 = vrot.lane.b32.xlu0 %v2034_v49, %s2106_s3 }
0x13c6   :  { %v1098_v56 = vpop.permute.xlu0 %1097 }
0x13c7   :  { %v1100_v58 = vmul.f32 %v1098_v56, %v1095_v50 }
0x13c9   :  { %v1102_v59 = vadd.f32 %v1101_v57, %v1100_v58 }
0x13cb   :  { %1104 = vrot.lane.b32.xlu1 %v1102_v59, %s2106_s3 }
0x143d   :  { %v2522_v61 = vpop.permute.xlu1 %1104 }
0x143e   :  { %1920 = vmatmul.msk.f32.vlgmr.msrb.gmra.mxu0 %vm141_vm4, %v2522_v61 }
0x14bb   :  { %v1125_v10 = vpop.f32.mrf.mxu0 }
0x14bc   :  { %v1148_v6 = vadd.f32 %v1125_v10, %v2394_v62  ;;  %v1128_v1 = vadd.f32 %v1125_v10, %v776_v0 }
0x14be   :  { %1150 = vrot.lane.b32.xlu2 %v1148_v6, %s2104_s1  ;;  %v1921_v2 = vmul.f32 -1.442695, %v1128_v1 }
0x14c0   :  { %2035 = vpow2.f32 %v1921_v2 }
0x14c6   :  { %v2036_v3 = vpop.eup %2035 }
0x14c7   :  { %v1132_v5 = vadd.f32 1.0, %v2036_v3 }
0x14c9   :  { %2037 = vrcp.f32 %v1132_v5  ;;  %v1144_v22 = vand.u32 2147483648, %v1132_v5  ;;  %vm1138_vm5 = vweird.f32 %v1132_v5  ;;  %v1142_v23 = vand.u32 2147483647, %v1132_v5 }
0x14cb   :  { %v1145_v26 = vor.u32 1.1754944e-38, %v1144_v22  ;;  %vm1143_vm7 = vcmp.eq.f32.partialorder %v1142_v23, 8.507059e+37 }
0x14cf   :  { %v2038_v9 = vpop.eup %2037 }
0x14d0   :  { %v1134_v12 = vmul.f32 %v2038_v9, %v1132_v5  ;;  %vm1139_vm3 = vweird.f32 %v2038_v9 }
0x14d1   :  { %vm1140_vm6 = vmor %vm1138_vm5, %vm1139_vm3  ;;  %vm1738_vm5 = vcmask 27648  }
0x14d2   :  { %v1135_v14 = vsub.f32 1.0, %v1134_v12 }
0x14d4   :  { %v1136_v15 = vmul.f32 %v2038_v9, %v1135_v14  ;;  %v816_v14 = vadd.f32 %v2403_v7, %v2492_v31 }
0x14d6   :  { %v1137_v21 = vadd.f32 %v2038_v9, %v1136_v15 }
0x14d8   :  { %v1141_v25 = vsel %vm1140_vm6, %v2038_v9, %v1137_v21 }
0x14d9   :  { %v1146_v27 = vsel %vm1143_vm7, %v1145_v26, %v1141_v25 }
0x14da   :  { %v1160_v19 = vsub.f32 1.0, %v1146_v27  ;;  %v1166_v63 = vmul.f32 %v1146_v27, %v1102_v59 }
0x1518   :  { %v1151_v60 = vpop.permute.xlu2 %1150 }
0x1519   :  { %v1153_v28 = vmul.f32 %v1151_v60, %v1146_v27 }
0x151b   :  { %1155 = vrot.lane.b32.xlu0 %v1153_v28, %s2104_s1 }
0x158d   :  { %v1156_v30 = vpop.permute.xlu0 %1155 }
0x158e   :  { %v1158_v17 = vadd.f32 %v1156_v30, %v776_v0 }
0x1590   :  { %2039 = vtanh.f32 %v1158_v17 }
0x1596   :  { %v2040_v18 = vpop.eup %2039 }
0x1597   :  { %1162 = vrot.lane.b32.xlu1 %v2040_v18, %s2106_s3 }
0x1609   :  { %v1163_v20 = vpop.permute.xlu1 %1162 }
0x160a   :  { %v1165_v4 = vmul.f32 %v1163_v20, %v1160_v19 }
0x160c   :  { %v2532_v32 = vadd.f32 %v1166_v63, %v1165_v4 }
0x160e   :  { %1169 = vrot.lane.b32.xlu2 %v2532_v32, %s2106_s3 }
0x1668   :  { %v1170_v53 = vpop.permute.xlu2 %1169 }
0x1669   :  { %1922 = vmatmul.msk.f32.vlgmr.msrb.gmra.mxu1 %vm141_vm4, %v1170_v53 }
0x166a   :  { %1506 = vmatpush.msrb.mxu1 %v2539_v29 }
0x166c   :  { %1507 = vmatpush.msrb.mxu1 %v2544_v33 }
0x166e   :  { %1508 = vmatpush.msrb.mxu1 %v2551_v34 }
0x1670   :  { %1509 = vmatpush.msrb.mxu1 %v2559_v52 }
0x1671   :  { %1929 = vmatmul.msk.f32.vlgmr.msra.gmra.mxu1 %vm141_vm4, %v2438_v51 }
0x1672   :  { %1589 = vmatpush.msra.mxu1 %v2575_v35 }
0x1674   :  { %1590 = vmatpush.msra.mxu1 %v2583_v54 }
0x1676   :  { %1591 = vmatpush.msra.mxu1 %v2589_v55 }
0x1678   :  { %1592 = vmatpush.msra.mxu1 %v2595_v8 }
0x1679   :  { %1933 = vmatmul.msk.f32.vlgmr.msrb.gmra.mxu1 %vm141_vm4, %v1170_v53 }
0x167a   :  { %1669 = vmatpush.msrb.mxu1 %v2575_v35 }
0x167c   :  { %1670 = vmatpush.msrb.mxu1 %v2583_v54 }
0x167e   :  { %1671 = vmatpush.msrb.mxu1 %v2589_v55 }
0x1680   :  { %1672 = vmatpush.msrb.mxu1 %v2595_v8 }
0x1681   :  { %1937 = vmatmul.msk.f32.vlgmr.msra.gmra.mxu1 %vm141_vm4, %v2438_v51 }
0x1689   :  { %1941 = vmatmul.msk.f32.vlgmr.msrb.gmra.mxu1 %vm141_vm4, %v1170_v53 }
0x16e6   :  { %v1190_v36 = vpop.f32.mrf.mxu1 }
0x16e7   :  { %v1213_v37 = vadd.f32 %v1190_v36, %v2394_v62  ;;  %v1193_v39 = vadd.f32 %v1190_v36, %v796_v38 }
0x16e9   :  { %1215 = vrot.lane.b32.xlu0 %v1213_v37, %s2104_s1  ;;  %v1923_v11 = vmul.f32 -1.442695, %v1193_v39 }
0x16eb   :  { %2041 = vpow2.f32 %v1923_v11 }
0x16f1   :  { %v2042_v13 = vpop.eup %2041 }
0x16f2   :  { %v1197_v40 = vadd.f32 1.0, %v2042_v13 }
0x16f4   :  { %2043 = vrcp.f32 %v1197_v40  ;;  %v1209_v47 = vand.u32 2147483648, %v1197_v40  ;;  %vm1203_vm9 = vweird.f32 %v1197_v40  ;;  %v1207_v48 = vand.u32 2147483647, %v1197_v40 }
0x16f6   :  { %v1210_v50 = vor.u32 1.1754944e-38, %v1209_v47  ;;  %vm1208_vm11 = vcmp.eq.f32.partialorder %v1207_v48, 8.507059e+37 }
0x16fa   :  { %v2044_v42 = vpop.eup %2043 }
0x16fb   :  { %v1199_v43 = vmul.f32 %v2044_v42, %v1197_v40  ;;  %vm1204_vm8 = vweird.f32 %v2044_v42 }
0x16fc   :  { %vm1205_vm10 = vmor %vm1203_vm9, %vm1204_vm8 }
0x16fd   :  { %v1200_v45 = vsub.f32 1.0, %v1199_v43 }
0x16ff   :  { %v1201_v51 = vmul.f32 %v2044_v42, %v1200_v45 }
0x1701   :  { %v1202_v46 = vadd.f32 %v2044_v42, %v1201_v51 }
0x1703   :  { %v1206_v49 = vsel %vm1205_vm10, %v2044_v42, %v1202_v46  ;;  %v841_v42 = vadd.f32 %v2403_v7, %v2514_v41 }
0x1704   :  { %v1211_v56 = vsel %vm1208_vm11, %v1210_v50, %v1206_v49 }
0x1705   :  { %v1225_v6 = vsub.f32 1.0, %v1211_v56  ;;  %v1231_v1 = vmul.f32 %v1211_v56, %v2532_v32 }
0x175b   :  { %v1216_v44 = vpop.permute.xlu0 %1215 }
0x175c   :  { %v1218_v57 = vmul.f32 %v1216_v44, %v1211_v56 }
0x175e   :  { %1220 = vrot.lane.b32.xlu1 %v1218_v57, %s2104_s1 }
0x17d0   :  { %v1221_v58 = vpop.permute.xlu1 %1220 }
0x17d1   :  { %v1223_v59 = vadd.f32 %v1221_v58, %v796_v38 }
0x17d3   :  { %2045 = vtanh.f32 %v1223_v59 }
0x17d9   :  { %v2046_v10 = vpop.eup %2045 }
0x17da   :  { %1227 = vrot.lane.b32.xlu2 %v2046_v10, %s2106_s3 }
0x1834   :  { %v1228_v0 = vpop.permute.xlu2 %1227 }
0x1835   :  { %v1230_v2 = vmul.f32 %v1228_v0, %v1225_v6  ;;  %v1366_v0 = vld [vmem:[%s2752_s9 + $0x18] sm:$0xff] }
0x1836   :  { %1403 = vmatpush.msra.mxu0 %v1366_v0 }
0x1837   :  { %v1232_v3 = vadd.f32 %v1231_v1, %v1230_v2  ;;  %v1365_v1 = vld [vmem:[%s2752_s9 + $0x10] sm:$0xff]  ;;  %v1364_v2 = vld [vmem:[%s2752_s9 + $0x8] sm:$0xff] }
0x1838   :  { %1404 = vmatpush.msra.mxu0 %v1365_v1 }
0x1839   :  { %1234 = vrot.lane.b32.xlu0 %v1232_v3, %s2106_s3 }
0x183a   :  { %1405 = vmatpush.msra.mxu0 %v1364_v2 }
0x18ab   :  { %v1235_v5 = vpop.permute.xlu0 %1234 }
0x18ac   :  { %1924 = vmatmul.msk.f32.vlgmr.msrb.gmra.mxu2 %vm141_vm4, %v1235_v5 }
0x18ad   :  { %1526 = vmatpush.msrb.mxu2 %v2539_v29 }
0x18af   :  { %1527 = vmatpush.msrb.mxu2 %v2544_v33 }
0x18b1   :  { %1528 = vmatpush.msrb.mxu2 %v2551_v34 }
0x18b3   :  { %1529 = vmatpush.msrb.mxu2 %v2559_v52 }
0x18b4   :  { %1930 = vmatmul.msk.f32.vlgmr.msra.gmra.mxu2 %vm141_vm4, %v2484_v16 }
0x18b5   :  { %1609 = vmatpush.msra.mxu2 %v2575_v35 }
0x18b7   :  { %1610 = vmatpush.msra.mxu2 %v2583_v54 }
0x18b9   :  { %1611 = vmatpush.msra.mxu2 %v2589_v55 }
0x18bb   :  { %1612 = vmatpush.msra.mxu2 %v2595_v8 }
0x18bc   :  { %1934 = vmatmul.msk.f32.vlgmr.msrb.gmra.mxu2 %vm141_vm4, %v1235_v5 }
0x18bd   :  { %1689 = vmatpush.msrb.mxu2 %v2575_v35 }
0x18bf   :  { %1690 = vmatpush.msrb.mxu2 %v2583_v54 }
0x18c1   :  { %1691 = vmatpush.msrb.mxu2 %v2589_v55 }
0x18c3   :  { %1692 = vmatpush.msrb.mxu2 %v2595_v8 }
0x18c4   :  { %1938 = vmatmul.msk.f32.vlgmr.msra.gmra.mxu2 %vm141_vm4, %v2484_v16 }
0x18cc   :  { %1942 = vmatmul.msk.f32.vlgmr.msrb.gmra.mxu2 %vm141_vm4, %v1235_v5 }
0x192f   :  { %v1255_v9 = vpop.f32.mrf.mxu2 }
0x1930   :  { %v1278_v12 = vadd.f32 %v1255_v9, %v2394_v62  ;;  %v1258_v15 = vadd.f32 %v1255_v9, %v816_v14 }
0x1932   :  { %1280 = vrot.lane.b32.xlu1 %v1278_v12, %s2104_s1  ;;  %v1925_v21 = vmul.f32 -1.442695, %v1258_v15 }
0x1934   :  { %2047 = vpow2.f32 %v1925_v21 }
0x193a   :  { %v2048_v22 = vpop.eup %2047 }
0x193b   :  { %v1262_v23 = vadd.f32 1.0, %v2048_v22 }
0x193d   :  { %2049 = vrcp.f32 %v1262_v23  ;;  %v1274_v28 = vand.u32 2147483648, %v1262_v23  ;;  %vm1268_vm13 = vweird.f32 %v1262_v23  ;;  %v1272_v30 = vand.u32 2147483647, %v1262_v23 }
0x193f   :  { %v1275_v18 = vor.u32 1.1754944e-38, %v1274_v28  ;;  %vm1273_vm15 = vcmp.eq.f32.partialorder %v1272_v30, 8.507059e+37 }
0x1943   :  { %v2050_v25 = vpop.eup %2049 }
0x1944   :  { %v1264_v26 = vmul.f32 %v2050_v25, %v1262_v23  ;;  %vm1269_vm12 = vweird.f32 %v2050_v25 }
0x1945   :  { %vm1270_vm14 = vmor %vm1268_vm13, %vm1269_vm12 }
0x1946   :  { %v1265_v60 = vsub.f32 1.0, %v1264_v26 }
0x1948   :  { %v1266_v16 = vmul.f32 %v2050_v25, %v1265_v60 }
0x194a   :  { %v1267_v27 = vadd.f32 %v2050_v25, %v1266_v16 }
0x194c   :  { %v1271_v17 = vsel %vm1270_vm14, %v2050_v25, %v1267_v27 }
0x194d   :  { %v1276_v19 = vsel %vm1273_vm15, %v1275_v18, %v1271_v17 }
0x194e   :  { %v1290_v53 = vsub.f32 1.0, %v1276_v19  ;;  %v1296_v37 = vmul.f32 %v1276_v19, %v1232_v3  ;;  %v1363_v3 = vld [vmem:[%s2752_s9] sm:$0xff] }
0x194f   :  { %1406 = vmatpush.msra.mxu0 %v1363_v3 }
0x1951   :  { %1486 = vmatpush.msrb.mxu0 %v2539_v29 }
0x1953   :  { %1487 = vmatpush.msrb.mxu0 %v2544_v33 }
0x1955   :  { %1488 = vmatpush.msrb.mxu0 %v2551_v34 }
0x1957   :  { %1489 = vmatpush.msrb.mxu0 %v2559_v52 }
0x19a4   :  { %v1281_v31 = vpop.permute.xlu1 %1280 }
0x19a5   :  { %v1283_v20 = vmul.f32 %v1281_v31, %v1276_v19 }
0x19a7   :  { %1285 = vrot.lane.b32.xlu2 %v1283_v20, %s2104_s1 }
0x1a01   :  { %v1286_v63 = vpop.permute.xlu2 %1285 }
0x1a02   :  { %v1288_v4 = vadd.f32 %v1286_v63, %v816_v14 }
0x1a04   :  { %2051 = vtanh.f32 %v1288_v4 }
0x1a0a   :  { %v2052_v32 = vpop.eup %2051 }
0x1a0b   :  { %1292 = vrot.lane.b32.xlu0 %v2052_v32, %s2106_s3 }
0x1a7d   :  { %v1293_v36 = vpop.permute.xlu0 %1292 }
0x1a7e   :  { %v1295_v38 = vmul.f32 %v1293_v36, %v1290_v53 }
0x1a80   :  { %v2640_v39 = vadd.f32 %v1296_v37, %v1295_v38 }
0x1a82   :  { %1299 = vrot.lane.b32.xlu1 %v2640_v39, %s2106_s3 }
0x1af4   :  { %v1300_v11 = vpop.permute.xlu1 %1299 }
0x1af5   :  { %1926 = vmatmul.msk.f32.vlgmr.msrb.gmra.mxu3 %vm141_vm4, %v1300_v11 }
0x1af6   :  { %1546 = vmatpush.msrb.mxu3 %v2539_v29 }
0x1af8   :  { %1547 = vmatpush.msrb.mxu3 %v2544_v33 }
0x1afa   :  { %1548 = vmatpush.msrb.mxu3 %v2551_v34 }
0x1afc   :  { %1549 = vmatpush.msrb.mxu3 %v2559_v52 }
0x1afd   :  { %1931 = vmatmul.msk.f32.vlgmr.msra.gmra.mxu3 %vm141_vm4, %v2510_v24 }
0x1afe   :  { %1629 = vmatpush.msra.mxu3 %v2575_v35 }
0x1b00   :  { %1630 = vmatpush.msra.mxu3 %v2583_v54 }
0x1b02   :  { %1631 = vmatpush.msra.mxu3 %v2589_v55 }
0x1b04   :  { %1632 = vmatpush.msra.mxu3 %v2595_v8 }
0x1b05   :  { %1935 = vmatmul.msk.f32.vlgmr.msrb.gmra.mxu3 %vm141_vm4, %v1300_v11 }
0x1b06   :  { %1709 = vmatpush.msrb.mxu3 %v2575_v35 }
0x1b08   :  { %1710 = vmatpush.msrb.mxu3 %v2583_v54 }
0x1b0a   :  { %1711 = vmatpush.msrb.mxu3 %v2589_v55 }
0x1b0c   :  { %1712 = vmatpush.msrb.mxu3 %v2595_v8 }
0x1b0d   :  { %1939 = vmatmul.msk.f32.vlgmr.msra.gmra.mxu3 %vm141_vm4, %v2510_v24 }
0x1b15   :  { %1943 = vmatmul.msk.f32.vlgmr.msrb.gmra.mxu3 %vm141_vm4, %v1300_v11 }
0x1b78   :  { %v1320_v13 = vpop.f32.mrf.mxu3 }
0x1b79   :  { %v1343_v40 = vadd.f32 %v1320_v13, %v2394_v62  ;;  %v1323_v43 = vadd.f32 %v1320_v13, %v841_v42 }
0x1b7b   :  { %1345 = vrot.lane.b32.xlu2 %v1343_v40, %s2104_s1  ;;  %v1927_v45 = vmul.f32 -1.442695, %v1323_v43 }
0x1b7d   :  { %2053 = vpow2.f32 %v1927_v45 }
0x1b83   :  { %v2054_v51 = vpop.eup %2053 }
0x1b84   :  { %v1327_v46 = vadd.f32 1.0, %v2054_v51 }
0x1b86   :  { %2055 = vrcp.f32 %v1327_v46  ;;  %v1339_v44 = vand.u32 2147483648, %v1327_v46  ;;  %vm1333_vm1 = vweird.f32 %v1327_v46  ;;  %v1337_v62 = vand.u32 2147483647, %v1327_v46 }
0x1b88   :  { %v1340_v57 = vor.u32 1.1754944e-38, %v1339_v44  ;;  %vm1338_vm3 = vcmp.eq.f32.partialorder %v1337_v62, 8.507059e+37 }
0x1b8c   :  { %v2056_v47 = vpop.eup %2055 }
0x1b8d   :  { %v1329_v48 = vmul.f32 %v2056_v47, %v1327_v46  ;;  %vm1334_vm0 = vweird.f32 %v2056_v47 }
0x1b8e   :  { %vm1335_vm2 = vmor %vm1333_vm1, %vm1334_vm0 }
0x1b8f   :  { %v1330_v49 = vsub.f32 1.0, %v1329_v48 }
0x1b91   :  { %v1331_v24 = vmul.f32 %v2056_v47, %v1330_v49 }
0x1b93   :  { %v1332_v50 = vadd.f32 %v2056_v47, %v1331_v24 }
0x1b95   :  { %v1336_v56 = vsel %vm1335_vm2, %v2056_v47, %v1332_v50 }
0x1b96   :  { %v1341_v41 = vsel %vm1338_vm3, %v1340_v57, %v1336_v56 }
0x1b97   :  { %v1355_v5 = vsub.f32 1.0, %v1341_v41  ;;  %v1361_v12 = vmul.f32 %v1341_v41, %v2640_v39 }
0x1bd5   :  { %v1346_v7 = vpop.permute.xlu2 %1345 }
0x1bd6   :  { %v1348_v58 = vmul.f32 %v1346_v7, %v1341_v41 }
0x1bd8   :  { %1350 = vrot.lane.b32.xlu0 %v1348_v58, %s2104_s1 }
0x1c4a   :  { %v1351_v59 = vpop.permute.xlu0 %1350 }
0x1c4b   :  { %v1353_v10 = vadd.f32 %v1351_v59, %v841_v42 }
0x1c4d   :  { %2057 = vtanh.f32 %v1353_v10 }
0x1c53   :  { %v2058_v6 = vpop.eup %2057 }
0x1c54   :  { %1357 = vrot.lane.b32.xlu1 %v2058_v6, %s2106_s3 }
0x1cc6   :  { %v1358_v9 = vpop.permute.xlu1 %1357 }
0x1cc7   :  { %v1360_v14 = vmul.f32 %v1358_v9, %v1355_v5 }
0x1cc9   :  { %v1362_v15 = vadd.f32 %v1361_v12, %v1360_v14 }
0x1ccb   :  { %1387 = vrot.lane.b32.xlu2 %v1362_v15, %s2106_s3 }
0x1d25   :  { %v1388_v21 = vpop.permute.xlu2 %1387 }
0x1d26   :  { %1928 = vmatmul.msk.f32.vlgmr.msra.gmra.mxu0 %vm141_vm4, %v1388_v21 }
0x1d27   :  { %1566 = vmatpush.msra.mxu0 %v2539_v29  ;;  %v1451_v29 = vpop.f32.mrf.mxu2 }
0x1d29   :  { %1567 = vmatpush.msra.mxu0 %v2544_v33  ;;  %v1431_v33 = vpop.f32.mrf.mxu1 }
0x1d2b   :  { %1568 = vmatpush.msra.mxu0 %v2551_v34  ;;  %v1959_v34 = vld [vmem:[%s2755_s12] ss:$0 sm:$0xff] }
0x1d2c   :  { %v1452_v22 = vadd.f32 %v1959_v34, %v1451_v29 }
0x1d2d   :  { %1569 = vmatpush.msra.mxu0 %v2559_v52  ;;  %v1961_v52 = vld [vmem:[%s2753_s10] ss:$0 sm:$0xff] }
0x1d2e   :  { %1932 = vmatmul.msk.f32.vlgmr.msrb.gmra.mxu0 %vm141_vm4, %v2522_v61 }
0x1d2f   :  { %1649 = vmatpush.msrb.mxu0 %v2575_v35  ;;  %v1531_v60 = vpop.f32.mrf.mxu2 }
0x1d30   :  { %v1532_v17 = vadd.f32 %v1959_v34, %v1531_v60 }
0x1d31   :  { %1650 = vmatpush.msrb.mxu0 %v2583_v54  ;;  %v1511_v16 = vpop.f32.mrf.mxu1 }
0x1d32   :  { %v1512_v18 = vadd.f32 %v1959_v34, %v1511_v16 }
0x1d33   :  { %1651 = vmatpush.msrb.mxu0 %v2589_v55 }
0x1d35   :  { %1652 = vmatpush.msrb.mxu0 %v2595_v8 }
0x1d36   :  { %1936 = vmatmul.msk.f32.vlgmr.msra.gmra.mxu0 %vm141_vm4, %v1388_v21 }
0x1d37   :  { %1729 = vmatpush.msra.mxu0 %v2575_v35  ;;  %v1471_v35 = vpop.f32.mrf.mxu3 }
0x1d39   :  { %1730 = vmatpush.msra.mxu0 %v2583_v54 }
0x1d3b   :  { %1731 = vmatpush.msra.mxu0 %v2589_v55  ;;  %v1432_v55 = vadd.f32 %v1959_v34, %v1431_v33 }
0x1d3d   :  { %1732 = vmatpush.msra.mxu0 %v2595_v8  ;;  %v1472_v8 = vadd.f32 %v1959_v34, %v1471_v35  ;;  %v1380_v35 = vld [vmem:[%s2758_s15 + $0x10] sm:$0xff] }
0x1d3e   :  { %1940 = vmatmul.msk.f32.vlgmr.msrb.gmra.mxu0 %vm141_vm4, %v2522_v61 }
0x1d3f   :  { %v1551_v32 = vpop.f32.mrf.mxu3 }
0x1d40   :  { %v1552_v38 = vadd.f32 %v1959_v34, %v1551_v32 }
0x1d46   :  { %1944 = vmatmul.msk.f32.vlgmr.msra.gmra.mxu0 %vm141_vm4, %v1388_v21 }
0x1da3   :  { %v1408_v54 = vpop.f32.mrf.mxu0 }
0x1da4   :  { %v1409_v23 = vadd.f32 %v1961_v52, %v1408_v54  ;;  %v1381_v52 = vld [vmem:[%s2758_s15 + $0x18] sm:$0xff] }
0x1da5   :  { %1858 = vmatpush.msra.mxu1 %v1381_v52 }
0x1da6   :  { %v1748_v61 = vmul.f32 %v1472_v8, %v1409_v23  ;;  %v1743_v25 = vmul.f32 %v1452_v22, %v1409_v23  ;;  %v1737_v26 = vmul.f32 %v1432_v55, %v1409_v23  ;;  %v1763_v20 = vmul.f32 %v1532_v17, %v1409_v23  ;;  %v1379_v22 = vld [vmem:[%s2758_s15 + $0x8] sm:$0xff] }
0x1da7   :  { %v1758_v63 = vmul.f32 %v1512_v18, %v1409_v23  ;;  %v1768_v13 = vmul.f32 %v1552_v38, %v1409_v23  ;;  %1859 = vmatpush.msra.mxu1 %v1380_v35 }
0x1da8   :  { %v1749_v27 = vsel %vm1738_vm5, %v1748_v61, 0.0  ;;  %v1744_v28 = vsel %vm1738_vm5, %v1743_v25, 0.0  ;;  %v1739_v30 = vsel %vm1738_vm5, %v1737_v26, 0.0  ;;  %v1764_v36 = vsel %vm1738_vm5, %v1763_v20, 0.0  ;;  %v1378_v61 = vld [vmem:[%s2758_s15] sm:$0xff] }
0x1da9   :  { %1750 = vadd.xlane.f32.xlu2 %v1749_v27  ;;  %1745 = vadd.xlane.f32.xlu1 %v1744_v28  ;;  %v1759_v37 = vsel %vm1738_vm5, %v1758_v63, 0.0  ;;  %v1769_v42 = vsel %vm1738_vm5, %v1768_v13, 0.0  ;;  %v1614_v13 = vpop.f32.mrf.mxu2 }
0x1daa   :  { %1740 = vadd.xlane.f32.xlu0 %v1739_v30  ;;  %1860 = vmatpush.msra.mxu1 %v1379_v22  ;;  %v1962_v22 = vld [vmem:[%s2759_s16] ss:$0 sm:$0xff] }
0x1dab   :  { %v1491_v31 = vpop.f32.mrf.mxu0 }
0x1dac   :  { %v1492_v19 = vadd.f32 %v1959_v34, %v1491_v31  ;;  %1861 = vmatpush.msra.mxu1 %v1378_v61 }
0x1dae   :  { %v1753_v4 = vmul.f32 %v1492_v19, %v1409_v23 }
0x1db0   :  { %v1754_v53 = vsel %vm1738_vm5, %v1753_v4, 0.0 }
0x1db1   :  { %1755 = vadd.xlane.f32.xlu2 %v1754_v53  ;;  %1765 = vadd.xlane.f32.xlu1 %v1764_v36 }
0x1db2   :  { %1760 = vadd.xlane.f32.xlu0 %v1759_v37 }
0x1db3   :  { %v1571_v39 = vpop.f32.mrf.mxu0 }
0x1db4   :  { %v1572_v11 = vadd.f32 %v1959_v34, %v1571_v39  ;;  %v1594_v39 = vpop.f32.mrf.mxu1 }
0x1db6   :  { %v1773_v40 = vmul.f32 %v1572_v11, %v1409_v23  ;;  %v1960_v11 = vld [vmem:[%s2757_s14] ss:$0 sm:$0xff] }
0x1db8   :  { %v1774_v43 = vsel %vm1738_vm5, %v1773_v40, 0.0  ;;  %v1634_v40 = vpop.f32.mrf.mxu3 }
0x1db9   :  { %1770 = vadd.xlane.f32.xlu2 %v1769_v42 }
0x1dba   :  { %1775 = vadd.xlane.f32.xlu0 %v1774_v43  ;;  %v1595_v43 = vadd.f32 %v1960_v11, %v1594_v39 }
0x1e1c   :  { %v1751_v45 = vpop.xlane.xlu2 %1750  ;;  %v1746_v51 = vpop.xlane.xlu1 %1745 }
0x1e1d   :  { %v1747_v46 = vmul.f32 0.5, %v1746_v51  ;;  %v1741_v47 = vpop.xlane.xlu0 %1740  ;;  %v1752_v24 = vmul.f32 0.5, %v1751_v45  ;;  %v1654_v45 = vpop.f32.mrf.mxu0  ;;  %v1615_v51 = vadd.f32 %v1960_v11, %v1614_v13 }
0x1e1e   :  { %v1742_v48 = vmul.f32 0.5, %v1741_v47 }
0x1e20   :  { %v1778_v49 = vmax.f32 %v1742_v48, %v1747_v46 }
0x1e22   :  { %v1779_v62 = vmax.f32 %v1778_v49, %v1752_v24  ;;  %v1635_v49 = vadd.f32 %v1960_v11, %v1634_v40 }
0x1e24   :  { %v1756_v50 = vpop.xlane.xlu2 %1755  ;;  %v1766_v41 = vpop.xlane.xlu1 %1765 }
0x1e25   :  { %v1757_v44 = vmul.f32 0.5, %v1756_v50  ;;  %v1761_v56 = vpop.xlane.xlu0 %1760  ;;  %v1767_v59 = vmul.f32 0.5, %v1766_v41 }
0x1e26   :  { %v1762_v7 = vmul.f32 0.5, %v1761_v56  ;;  %v1655_v56 = vadd.f32 %v1960_v11, %v1654_v45 }
0x1e27   :  { %v1780_v57 = vmax.f32 %v1779_v62, %v1757_v44  ;;  %v1674_v62 = vpop.f32.mrf.mxu1 }
0x1e29   :  { %v1781_v58 = vmax.f32 %v1780_v57, %v1762_v7 }
0x1e2b   :  { %v1782_v0 = vmax.f32 %v1781_v58, %v1767_v59  ;;  %v1694_v58 = vpop.f32.mrf.mxu2 }
0x1e2c   :  { %v1771_v10 = vpop.xlane.xlu2 %1770 }
0x1e2d   :  { %v1772_v6 = vmul.f32 0.5, %v1771_v10  ;;  %v1776_v1 = vpop.xlane.xlu0 %1775 }
0x1e2e   :  { %v1777_v3 = vmul.f32 0.5, %v1776_v1  ;;  %v1714_v1 = vpop.f32.mrf.mxu3 }
0x1e2f   :  { %v1783_v2 = vmax.f32 %v1782_v0, %v1772_v6 }
0x1e31   :  { %v1784_v5 = vmax.f32 %v1783_v2, %v1777_v3  ;;  %v1695_v2 = vadd.f32 %v1960_v11, %v1694_v58 }
0x1e33   :  { %v1785_v9 = vsub.f32 %v1742_v48, %v1784_v5  ;;  %v1788_v12 = vsub.f32 %v1747_v46, %v1784_v5  ;;  %v1791_v14 = vsub.f32 %v1752_v24, %v1784_v5  ;;  %v1794_v15 = vsub.f32 %v1757_v44, %v1784_v5 }
0x1e34   :  { %v1797_v34 = vsub.f32 %v1762_v7, %v1784_v5  ;;  %v1800_v55 = vsub.f32 %v1767_v59, %v1784_v5  ;;  %v1803_v23 = vsub.f32 %v1772_v6, %v1784_v5  ;;  %v1806_v26 = vsub.f32 %v1777_v3, %v1784_v5 }
0x1e35   :  { %v1786_v21 = vmul.f32 1.442695, %v1785_v9  ;;  %v1789_v29 = vmul.f32 1.442695, %v1788_v12  ;;  %v1792_v33 = vmul.f32 1.442695, %v1791_v14  ;;  %v1675_v59 = vadd.f32 %v1960_v11, %v1674_v62  ;;  %v1734_v12 = vpop.f32.mrf.mxu0 }
0x1e36   :  { %v1795_v54 = vmul.f32 1.442695, %v1794_v15  ;;  %v1798_v8 = vmul.f32 1.442695, %v1797_v34  ;;  %v1801_v25 = vmul.f32 1.442695, %v1800_v55  ;;  %v1715_v14 = vadd.f32 %v1960_v11, %v1714_v1 }
0x1e37   :  { %2059 = vpow2.f32 %v1786_v21  ;;  %v1804_v27 = vmul.f32 1.442695, %v1803_v23  ;;  %v1807_v17 = vmul.f32 1.442695, %v1806_v26 }
0x1e38   :  { %2061 = vpow2.f32 %v1789_v29 }
0x1e39   :  { %2063 = vpow2.f32 %v1792_v33  ;;  %v1735_v33 = vadd.f32 %v1960_v11, %v1734_v12 }
0x1e3a   :  { %2065 = vpow2.f32 %v1795_v54 }
0x1e3b   :  { %2067 = vpow2.f32 %v1798_v8 }
0x1e3c   :  { %2069 = vpow2.f32 %v1801_v25 }
0x1e3d   :  { %v2060_v60 = vpop.eup %2059  ;;  %2071 = vpow2.f32 %v1804_v27 }
0x1e3e   :  { %v2062_v16 = vpop.eup %2061  ;;  %2073 = vpow2.f32 %v1807_v17 }
0x1e3f   :  { %v1809_v28 = vadd.f32 %v2062_v16, %v2060_v60  ;;  %v2064_v30 = vpop.eup %2063 }
0x1e40   :  { %v2066_v31 = vpop.eup %2065 }
0x1e41   :  { %v1810_v18 = vadd.f32 %v2064_v30, %v1809_v28  ;;  %v2068_v20 = vpop.eup %2067 }
0x1e42   :  { %v2070_v4 = vpop.eup %2069 }
0x1e43   :  { %v1811_v19 = vadd.f32 %v2066_v31, %v1810_v18  ;;  %v2072_v53 = vpop.eup %2071 }
0x1e44   :  { %v2074_v37 = vpop.eup %2073 }
0x1e45   :  { %v1812_v63 = vadd.f32 %v2068_v20, %v1811_v19 }
0x1e47   :  { %v1813_v32 = vadd.f32 %v2070_v4, %v1812_v63 }
0x1e49   :  { %v1814_v36 = vadd.f32 %v2072_v53, %v1813_v32 }
0x1e4b   :  { %v1815_v38 = vadd.f32 %v2074_v37, %v1814_v36 }
0x1e4d   :  { %2075 = vrcp.f32 %v1815_v38 }
0x1e53   :  { %v2076_v42 = vpop.eup %2075 }
0x1e54   :  { %v1817_v46 = vmul.f32 %v2076_v42, %v2060_v60  ;;  %v1819_v47 = vmul.f32 %v2076_v42, %v2062_v16  ;;  %v1822_v48 = vmul.f32 %v2076_v42, %v2064_v30  ;;  %v1825_v44 = vmul.f32 %v2076_v42, %v2066_v31 }
0x1e55   :  { %v1828_v41 = vmul.f32 %v2076_v42, %v2068_v20  ;;  %v1831_v0 = vmul.f32 %v2076_v42, %v2070_v4  ;;  %v1834_v9 = vmul.f32 %v2076_v42, %v2072_v53  ;;  %v1837_v15 = vmul.f32 %v2076_v42, %v2074_v37 }
0x1e56   :  { %v1818_v24 = vmul.f32 %v1817_v46, %v1595_v43  ;;  %v1820_v50 = vmul.f32 %v1819_v47, %v1615_v51  ;;  %v1823_v7 = vmul.f32 %v1822_v48, %v1635_v49  ;;  %v1826_v6 = vmul.f32 %v1825_v44, %v1655_v56 }
0x1e57   :  { %v1829_v5 = vmul.f32 %v1828_v41, %v1675_v59  ;;  %v1832_v29 = vmul.f32 %v1831_v0, %v1695_v2  ;;  %v1835_v52 = vmul.f32 %v1834_v9, %v1715_v14  ;;  %v1838_v35 = vmul.f32 %v1837_v15, %v1735_v33 }
0x1e58   :  { %v1821_v57 = vadd.f32 %v1820_v50, %v1818_v24 }
0x1e5a   :  { %v1824_v10 = vadd.f32 %v1823_v7, %v1821_v57 }
0x1e5c   :  { %v1827_v3 = vadd.f32 %v1826_v6, %v1824_v10 }
0x1e5e   :  { %v1830_v21 = vadd.f32 %v1829_v5, %v1827_v3 }
0x1e60   :  { %v1833_v34 = vadd.f32 %v1832_v29, %v1830_v21 }
0x1e62   :  { %v1836_v54 = vadd.f32 %v1835_v52, %v1833_v34 }
0x1e64   :  { %v1839_v55 = vadd.f32 %v1838_v35, %v1836_v54 }
0x1e66   :  { %1945 = vmatmul.msk.f32.vlgmr.msra.gmra.mxu1 %vm141_vm4, %v1839_v55 }
0x1ee3   :  { %v1863_v8 = vpop.f32.mrf.mxu1 }
0x1ee4   :  { %v1864_v23 = vadd.f32 %v1962_v22, %v1863_v8 }
0x1ee6   :  { %1866 = vst.msk [vmem:[#allocation2] sm:$0xf] %vm1738_vm5, %v1864_v23 }
0x1ee7   :  { %1877 = dma.vmem_to_hbm [thread:$0]  %s1873_s2, 64, %s1875_s6, [#allocation3]  }
0x1ee8   :  { %2101 = dma.done.wait [#allocation3], 64  }
0x1ee9   :  { %2102 = vsyncadd [#allocation3], 4294967232 }
0x1eea   :  { %1882 = vsyncpa [#allocation3], 1 }

</bundles_post_ra>
